<compile_context>
chip_gen: v5e
topology: v5e:2x2
jax: 0.10.0
libtpu: 0.0.40
codegen_flags: <defaults>
</compile_context>

<pallas_src>
import functools

import jax
import jax.numpy as jnp
from jax import lax
from jax.experimental import pallas as pl
from jax.experimental.pallas import tpu as pltpu


# ---------------------------------------------------------------------------
# Fused kernel. One grid step processes a (Bb, N, E) slab of the batch.
#   x:     (Bb, N, E)
#   wqkv:  (E, 3E)   = [WqT | WkT | WvT]        bqkv: (1, 3E)
#   wp:    (E, E)    = WpT                      bp:   (1, E)
#   out:   (Bb, N, E)
# ---------------------------------------------------------------------------
def mha_kernel(x_ref, wqkv_ref, wp_ref, bqkv_ref, bp_ref, o_ref,
               *, num_heads, scaling):
    Bb, N, E = x_ref.shape
    D = E // num_heads

    # Fold batch into the M dimension for all projections (better MXU rows).
    x2 = x_ref[...].reshape(Bb * N, E)                       # (M, E), M = Bb*N

    # Fused QKV projection: one K=E matmul with a 3E-wide output.
    qkv = (jnp.dot(x2, wqkv_ref[...], preferred_element_type=jnp.float32)
           + bqkv_ref[...])                                  # (M, 3E) f32
    q = qkv[:, 0:E]
    k = qkv[:, E:2 * E]
    v = qkv[:, 2 * E:3 * E]

    # Pack heads once: (M, E) -> (Bb*H, N, D). One relayout instead of 3*H
    # width-16 lane extracts.
    def to_heads(t):
        return (t.reshape(Bb, N, num_heads, D)
                 .transpose(0, 2, 1, 3)
                 .reshape(Bb * num_heads, N, D))

    qh = to_heads(q)
    kh = to_heads(k)
    vh = to_heads(v)

    # energy = q · k^T, batched over (batch*head).
    energy = lax.dot_general(
        qh, kh, (((2,), (2,)), ((0,), (0,))),
        preferred_element_type=jnp.float32)                  # (Bb*H, N, N)

    # Unnormalized softmax; normalization + post-softmax scaling are folded
    # into a per-row rescale AFTER the att@v matmul (exact math, same result).
    m = jnp.max(energy, axis=-1, keepdims=True)
    p = jnp.exp(energy - m)
    denom = jnp.sum(p, axis=-1, keepdims=True)               # (Bb*H, N, 1)

    r = lax.dot_general(
        p, vh, (((2,), (1,)), ((0,), (0,))),
        preferred_element_type=jnp.float32)                  # (Bb*H, N, D)
    out_h = r * (scaling / denom)                            # row rescale only

    # Re-pack heads back into the lane-dense E dimension: (Bb*H, N, D)->(M, E).
    out2 = (out_h.reshape(Bb, num_heads, N, D)
                  .transpose(0, 2, 1, 3)
                  .reshape(Bb * N, E))

    # Single K=E output projection (full MXU rows) + bias.
    y = (jnp.dot(out2, wp_ref[...], preferred_element_type=jnp.float32)
         + bp_ref[...])                                      # (M, E)

    o_ref[...] = y.reshape(Bb, N, E).astype(o_ref.dtype)


# ---------------------------------------------------------------------------
# Wrapper
# ---------------------------------------------------------------------------
def multi_head_attention(x, params, num_heads):
    """x: (B, N, E) float32. params holds PyTorch-layout Linear weights."""
    B, N, E = x.shape
    D = E // num_heads
    scaling = float(D) ** -0.5

    # Device-adaptive grid: 1 step on single-TC chips (v5e/v6e), 2 parallel
    # steps on v7x (one per TensorCore). Falls back to a single step.
    try:
        kind = jax.devices()[0].device_kind.lower()
    except Exception:  # pragma: no cover - defensive
        kind = ""
    num_tc = 2 if ("v7" in kind or "7x" in kind) else 1
    steps = num_tc if (num_tc <= B and B % num_tc == 0) else 1
    Bb = B // steps

    # Host-side fusion of the QKV weights/biases (PyTorch stores W as (out,in),
    # so we pass W^T for a plain x @ W^T + b matmul layout).
    wqkv_t = jnp.concatenate(
        [params["wq"].T, params["wk"].T, params["wv"].T], axis=1)     # (E, 3E)
    bqkv = jnp.concatenate(
        [params["bq"], params["bk"], params["bv"]]).reshape(1, 3 * E) # (1, 3E)
    wp_t = params["wp"].T                                             # (E, E)
    bp = params["bp"].reshape(1, E)                                   # (1, E)

    kernel = functools.partial(mha_kernel, num_heads=num_heads, scaling=scaling)

    # Advisory cost hint for XLA's scheduler.
    flops = B * (3 * 2 * N * E * E        # fused QKV projection
                 + 2 * 2 * N * N * E      # q@k^T and att@v over all heads
                 + 2 * N * E * E)         # output projection
    bytes_accessed = 4 * (2 * B * N * E + 4 * E * E + 4 * E)
    cost = pl.CostEstimate(flops=flops,
                           transcendentals=B * num_heads * N * N,
                           bytes_accessed=bytes_accessed)

    return pl.pallas_call(
        kernel,
        out_shape=jax.ShapeDtypeStruct((B, N, E), x.dtype),
        grid=(steps,),
        in_specs=[
            pl.BlockSpec((Bb, N, E), lambda b: (b, 0, 0)),     # x slab
            pl.BlockSpec((E, 3 * E), lambda b: (0, 0)),        # WqkvT (constant)
            pl.BlockSpec((E, E), lambda b: (0, 0)),            # WpT   (constant)
            pl.BlockSpec((1, 3 * E), lambda b: (0, 0)),        # bqkv
            pl.BlockSpec((1, E), lambda b: (0, 0)),            # bp
        ],
        out_specs=pl.BlockSpec((Bb, N, E), lambda b: (b, 0, 0)),
        compiler_params=pltpu.CompilerParams(
            dimension_semantics=("parallel",)),                # 2 TCs on v7x
        cost_estimate=cost,
    )(x, wqkv_t, wp_t, bqkv, bp)


# ---------------------------------------------------------------------------
# Pure-JAX reference mirroring the PyTorch forward (for verification)
# ---------------------------------------------------------------------------
def reference_forward(x, params, num_heads):
    B, N, E = x.shape
    D = E // num_heads
    scaling = float(D) ** -0.5

    def lin(inp, w, b):
        return inp @ w.T + b

    def split_heads(t):                                  # b n (h d) -> b h n d
        return t.reshape(B, N, num_heads, D).transpose(0, 2, 1, 3)

    q = split_heads(lin(x, params["wq"], params["bq"]))
    k = split_heads(lin(x, params["wk"], params["bk"]))
    v = split_heads(lin(x, params["wv"], params["bv"]))

    energy = jnp.einsum("bhqd,bhkd->bhqk", q, k)
    att = jax.nn.softmax(energy, axis=-1) * scaling      # scale AFTER softmax
    out = jnp.einsum("bhqk,bhkd->bhqd", att, v)
    out = out.transpose(0, 2, 1, 3).reshape(B, N, E)     # b h n d -> b n (h d)
    return lin(out, params["wp"], params["bp"])


if __name__ == "__main__":
    # small shapes consistent with the module: batch=2, seq=8, emb=128, heads=8
    # (E=128 keeps the output lane-dense: one full vreg lane width per row).
    B, N, E, H = 2, 8, 128, 8

    key = jax.random.PRNGKey(0)
    ks = jax.random.split(key, 9)
    s = 0.02
    params = {
        "wq": jax.random.normal(ks[0], (E, E), jnp.float32) * s,
        "bq": jax.random.normal(ks[1], (E,), jnp.float32) * s,
        "wk": jax.random.normal(ks[2], (E, E), jnp.float32) * s,
        "bk": jax.random.normal(ks[3], (E,), jnp.float32) * s,
        "wv": jax.random.normal(ks[4], (E, E), jnp.float32) * s,
        "bv": jax.random.normal(ks[5], (E,), jnp.float32) * s,
        "wp": jax.random.normal(ks[6], (E, E), jnp.float32) * s,
        "bp": jax.random.normal(ks[7], (E,), jnp.float32) * s,
    }
    x = jax.random.normal(ks[8], (B, N, E), jnp.float32)

    out = multi_head_attention(x, params, H)
    out = jax.block_until_ready(out)

    ref = reference_forward(x, params, H)
    assert out.shape == (B, N, E), out.shape
    assert jnp.allclose(out, ref, atol=1e-4, rtol=1e-4), float(
        jnp.abs(out - ref).max())

    print("KERNEL_OK")
</pallas_src>

<mosaic_0001>
module attributes {stable_mosaic.version = 11 : i64} {
  func.func @mha_kernel(%arg0: i32, %arg1: memref<2x8x128xf32, #tpu.memory_space<vmem>>, %arg2: memref<128x384xf32, #tpu.memory_space<vmem>>, %arg3: memref<128x128xf32, #tpu.memory_space<vmem>>, %arg4: memref<1x384xf32, #tpu.memory_space<vmem>>, %arg5: memref<1x128xf32, #tpu.memory_space<vmem>>, %arg6: memref<2x8x128xf32, #tpu.memory_space<vmem>>) attributes {dimension_semantics = [#tpu.dimension_semantics<parallel>], iteration_bounds = array<i64: 1>, scalar_prefetch = 0 : i64, scratch_operands = 0 : i64, tpu.core_type = #tpu.core_type<tc>, window_params = [{transform_indices = @transform_0, window_bounds = array<i64: 2, 8, 128>}, {pipeline_mode = #tpu.pipeline_mode<synchronous>, transform_indices = @transform_1, window_bounds = array<i64: 128, 384>}, {pipeline_mode = #tpu.pipeline_mode<synchronous>, transform_indices = @transform_2, window_bounds = array<i64: 128, 128>}, {pipeline_mode = #tpu.pipeline_mode<synchronous>, transform_indices = @transform_3, window_bounds = array<i64: 1, 384>}, {pipeline_mode = #tpu.pipeline_mode<synchronous>, transform_indices = @transform_4, window_bounds = array<i64: 1, 128>}, {transform_indices = @transform_5, window_bounds = array<i64: 2, 8, 128>}]} {
    %c0 = arith.constant 0 : index
    %c0_0 = arith.constant 0 : index
    %c0_1 = arith.constant 0 : index
    %0 = vector.load %arg1[%c0, %c0_0, %c0_1] : memref<2x8x128xf32, #tpu.memory_space<vmem>>, vector<2x8x128xf32>
    %1 = vector.shape_cast %0 : vector<2x8x128xf32> to vector<16x128xf32>
    %c0_2 = arith.constant 0 : index
    %c0_3 = arith.constant 0 : index
    %2 = vector.load %arg2[%c0_2, %c0_3] : memref<128x384xf32, #tpu.memory_space<vmem>>, vector<128x384xf32>
    %cst = arith.constant dense<0.000000e+00> : vector<16x384xf32>
    %3 = tpu.matmul %1, %2, %cst {dimension_numbers = #tpu.dot_dimension_numbers<[1], [0], [0], [1], [0, 0, 1, 1], [], []>} : vector<16x128xf32>, vector<128x384xf32>, vector<16x384xf32> -> vector<16x384xf32>
    %c0_4 = arith.constant 0 : index
    %c0_5 = arith.constant 0 : index
    %4 = vector.load %arg4[%c0_4, %c0_5] : memref<1x384xf32, #tpu.memory_space<vmem>>, vector<1x384xf32>
    %5 = vector.broadcast %4 : vector<1x384xf32> to vector<16x384xf32>
    %6 = arith.addf %3, %5 : vector<16x384xf32>
    %7 = vector.extract_strided_slice %6 {offsets = [0, 0], sizes = [16, 128], strides = [1, 1]} : vector<16x384xf32> to vector<16x128xf32>
    %8 = vector.extract_strided_slice %6 {offsets = [0, 128], sizes = [16, 128], strides = [1, 1]} : vector<16x384xf32> to vector<16x128xf32>
    %9 = vector.extract_strided_slice %6 {offsets = [0, 256], sizes = [16, 128], strides = [1, 1]} : vector<16x384xf32> to vector<16x128xf32>
    %10 = vector.shape_cast %7 : vector<16x128xf32> to vector<2x8x8x16xf32>
    %11 = tpu.transpose %10, [0, 2, 1, 3] : vector<2x8x8x16xf32> -> vector<2x8x8x16xf32>
    %12 = vector.shape_cast %11 : vector<2x8x8x16xf32> to vector<16x8x16xf32>
    %13 = vector.shape_cast %8 : vector<16x128xf32> to vector<2x8x8x16xf32>
    %14 = tpu.transpose %13, [0, 2, 1, 3] : vector<2x8x8x16xf32> -> vector<2x8x8x16xf32>
    %15 = vector.shape_cast %14 : vector<2x8x8x16xf32> to vector<16x8x16xf32>
    %16 = vector.shape_cast %9 : vector<16x128xf32> to vector<2x8x8x16xf32>
    %17 = tpu.transpose %16, [0, 2, 1, 3] : vector<2x8x8x16xf32> -> vector<2x8x8x16xf32>
    %18 = vector.shape_cast %17 : vector<2x8x8x16xf32> to vector<16x8x16xf32>
    %cst_6 = arith.constant dense<0.000000e+00> : vector<16x8x8xf32>
    %19 = tpu.matmul %12, %15, %cst_6 {dimension_numbers = #tpu.dot_dimension_numbers<[2], [2], [1], [1], [0, 0, 0, 1, 1, 1], [0], [0]>} : vector<16x8x16xf32>, vector<16x8x16xf32>, vector<16x8x8xf32> -> vector<16x8x8xf32>
    %cst_7 = arith.constant dense<0xFF800000> : vector<16x8xf32>
    %20 = vector.multi_reduction <maximumf>, %19, %cst_7 [2] : vector<16x8x8xf32> to vector<16x8xf32>
    %21 = vector.shape_cast %20 : vector<16x8xf32> to vector<16x8x1xf32>
    %22 = vector.broadcast %21 : vector<16x8x1xf32> to vector<16x8x8xf32>
    %23 = arith.subf %19, %22 : vector<16x8x8xf32>
    %24 = math.exp %23 : vector<16x8x8xf32>
    %cst_8 = arith.constant dense<0.000000e+00> : vector<16x8xf32>
    %25 = vector.multi_reduction <add>, %24, %cst_8 [2] : vector<16x8x8xf32> to vector<16x8xf32>
    %26 = vector.shape_cast %25 : vector<16x8xf32> to vector<16x8x1xf32>
    %cst_9 = arith.constant dense<0.000000e+00> : vector<16x8x16xf32>
    %27 = tpu.matmul %24, %18, %cst_9 {dimension_numbers = #tpu.dot_dimension_numbers<[2], [1], [1], [2], [0, 0, 0, 1, 1, 2], [0], [0]>} : vector<16x8x8xf32>, vector<16x8x16xf32>, vector<16x8x16xf32> -> vector<16x8x16xf32>
    %cst_10 = arith.constant 2.500000e-01 : f32
    %28 = vector.broadcast %cst_10 : f32 to vector<16x8x1xf32>
    %29 = arith.divf %28, %26 : vector<16x8x1xf32>
    %30 = vector.broadcast %29 : vector<16x8x1xf32> to vector<16x8x16xf32>
    %31 = arith.mulf %27, %30 : vector<16x8x16xf32>
    %32 = vector.shape_cast %31 : vector<16x8x16xf32> to vector<2x8x8x16xf32>
    %33 = tpu.transpose %32, [0, 2, 1, 3] : vector<2x8x8x16xf32> -> vector<2x8x8x16xf32>
    %34 = vector.shape_cast %33 : vector<2x8x8x16xf32> to vector<16x128xf32>
    %c0_11 = arith.constant 0 : index
    %c0_12 = arith.constant 0 : index
    %35 = vector.load %arg3[%c0_11, %c0_12] : memref<128x128xf32, #tpu.memory_space<vmem>>, vector<128x128xf32>
    %cst_13 = arith.constant dense<0.000000e+00> : vector<16x128xf32>
    %36 = tpu.matmul %34, %35, %cst_13 {dimension_numbers = #tpu.dot_dimension_numbers<[1], [0], [0], [1], [0, 0, 1, 1], [], []>} : vector<16x128xf32>, vector<128x128xf32>, vector<16x128xf32> -> vector<16x128xf32>
    %c0_14 = arith.constant 0 : index
    %c0_15 = arith.constant 0 : index
    %37 = vector.load %arg5[%c0_14, %c0_15] : memref<1x128xf32, #tpu.memory_space<vmem>>, vector<1x128xf32>
    %38 = vector.broadcast %37 : vector<1x128xf32> to vector<16x128xf32>
    %39 = arith.addf %36, %38 : vector<16x128xf32>
    %40 = vector.shape_cast %39 : vector<16x128xf32> to vector<2x8x128xf32>
    %c0_16 = arith.constant 0 : index
    %c0_17 = arith.constant 0 : index
    %c0_18 = arith.constant 0 : index
    %41 = vector.load %arg6[%c0_16, %c0_17, %c0_18] : memref<2x8x128xf32, #tpu.memory_space<vmem>>, vector<2x8x128xf32>
    tpu.vector_store %arg6[%c0_16, %c0_17, %c0_18], %40 {strides = array<i32>} : memref<2x8x128xf32, #tpu.memory_space<vmem>>, vector<2x8x128xf32>,
    return
  }
  func.func @transform_0(%arg0: i32) -> (i32, i32, i32) {
    %c0_i32 = arith.constant 0 : i32
    %c0_i32_0 = arith.constant 0 : i32
    %c0_i32_1 = arith.constant 0 : i32
    return %arg0, %c0_i32, %c0_i32_0 : i32, i32, i32
  }
  func.func @transform_1(%arg0: i32) -> (i32, i32) {
    %c0_i32 = arith.constant 0 : i32
    %c0_i32_0 = arith.constant 0 : i32
    %c0_i32_1 = arith.constant 0 : i32
    return %c0_i32, %c0_i32_0 : i32, i32
  }
  func.func @transform_2(%arg0: i32) -> (i32, i32) {
    %c0_i32 = arith.constant 0 : i32
    %c0_i32_0 = arith.constant 0 : i32
    %c0_i32_1 = arith.constant 0 : i32
    return %c0_i32, %c0_i32_0 : i32, i32
  }
  func.func @transform_3(%arg0: i32) -> (i32, i32) {
    %c0_i32 = arith.constant 0 : i32
    %c0_i32_0 = arith.constant 0 : i32
    %c0_i32_1 = arith.constant 0 : i32
    return %c0_i32, %c0_i32_0 : i32, i32
  }
  func.func @transform_4(%arg0: i32) -> (i32, i32) {
    %c0_i32 = arith.constant 0 : i32
    %c0_i32_0 = arith.constant 0 : i32
    %c0_i32_1 = arith.constant 0 : i32
    return %c0_i32, %c0_i32_0 : i32, i32
  }
  func.func @transform_5(%arg0: i32) -> (i32, i32, i32) {
    %c0_i32 = arith.constant 0 : i32
    %c0_i32_0 = arith.constant 0 : i32
    %c0_i32_1 = arith.constant 0 : i32
    return %arg0, %c0_i32, %c0_i32_0 : i32, i32, i32
  }
}

</mosaic_0001>

<bundles_post_ra>
// kernel: tpu_custom_call.1
= control target key start
LH: loop header
LB: loop body
LE: loop exit
PB: predicated region body
PF: predicated region fallthrough
CT: control target
= control target key end

     0   :  { %10 = vsyncpa [#allocation3], 0  ;;  %s5662_s0 = inlined_call_operand.hbm [shape: f32[2,8,128], index: 0, kind: input, shape index: {}]   ;;  %s5663_s1 = inlined_call_operand.hbm [shape: f32[128,384], index: 1, kind: input, shape index: {}]   ;;  %s5664_s2 = inlined_call_operand.hbm [shape: f32[128,128], index: 2, kind: input, shape index: {}]   ;;  %s5665_s3 = inlined_call_operand.hbm [shape: f32[1,384], index: 3, kind: input, shape index: {}]   ;;  %s5666_s4 = inlined_call_operand.vmem [shape: f32[1,128], index: 4, kind: input, shape index: {}]   ;;  %s5667_s5 = inlined_call_operand.hbm [shape: f32[2,8,128], index: 5, kind: output, shape index: {}]  }
   0x1   :  { %11 = vsyncpa [#allocation6], 0 }
   0x2   :  { %12 = vsyncpa [#allocation9], 0  ;;  %s31_s20 = sshll.u32 %s5663_s1, 4  ;;  %s32_s20 = int_to_ptr.hbm [resolvable:$true] %s31_s20 }
   0x3   :  { %13 = vsyncpa [#allocation4], 0  ;;  %s3776_s21 = smov [#allocation5]   ;;  %s18_s25 = sshll.u32 %s5662_s0, 4  ;;  %s19_s25 = int_to_ptr.hbm [resolvable:$true] %s18_s25 }
   0x4   :  { %s33_s22 = sshll.u32 %s3776_s21, 4  ;;  %s3777_s26 = smov 384   ;;  %s34_s22 = int_to_ptr.vmem [resolvable:$true] %s33_s22 }
   0x5   :  { %s3778_s27 = smov 24   ;;  %s3779_s28 = smov [#allocation2]  }
   0x6   :  { %39 = dma.hbm_to_vmem [thread:$0]  %s32_s20, 6144, %s34_s22, [#allocation6], %s3777_s26, %s3777_s26, %s3778_s27  }
   0x7   :  { %s20_s29 = sshll.u32 %s3779_s28, 4  ;;  %s3780_s30 = smov 128   ;;  %s21_s29 = int_to_ptr.vmem [resolvable:$true] %s20_s29 }
   0x8   :  { %s3781_s6 = smov 8   ;;  %s44_s8 = sshll.u32 %s5664_s2, 4  ;;  %s45_s8 = int_to_ptr.hbm [resolvable:$true] %s44_s8 }
   0x9   :  { %26 = dma.hbm_to_vmem [thread:$0]  %s19_s25, 256, %s21_s29, [#allocation3], %s3780_s30, %s3780_s30, %s3781_s6  }
   0xa   :  { %s3782_s9 = smov [#allocation7]   ;;  %s58_s12 = sshll.u32 %s5665_s3, 4  ;;  %s59_s12 = int_to_ptr.hbm [resolvable:$true] %s58_s12 }
   0xb   :  { %s46_s0 = sshll.u32 %s3782_s9, 4  ;;  %s3783_s13 = smov [#allocation8]   ;;  %s47_s0 = int_to_ptr.vmem [resolvable:$true] %s46_s0 }
   0xc   :  { %52 = dma.hbm_to_vmem [thread:$0]  %s45_s8, 2048, %s47_s0, [#allocation6], %s3780_s30, %s3780_s30, %s3781_s6  }
   0xd   :  { %s60_s14 = sshll.u32 %s3783_s13, 4  ;;  %s61_s14 = int_to_ptr.vmem [resolvable:$true] %s60_s14 }
   0xe   :  { %63 = dma.hbm_to_vmem [thread:$0]  %s59_s12, 48, %s61_s14, [#allocation9]  }
   0xf   :  { %3768 = dma.done.wait [#allocation3], 256  }
  0x10   :  { %3769 = vsyncadd [#allocation3], 4294967040 }
  0x11   :  { %3770 = dma.done.wait [#allocation6], 8192  }
  0x12   :  { %3771 = vsyncadd [#allocation6], 4294959104 }
  0x13   :  { %3772 = dma.done.wait [#allocation9], 48  }
  0x14   :  { %3773 = vsyncadd [#allocation9], 4294967248  ;;  %v130_v0 = vld [vmem:[#allocation5 + $0x170] sm:$0xff]  ;;  %v127_v1 = vld [vmem:[#allocation5 + $0x158] sm:$0xff]  ;;  %s3784_s2 = smov 48   ;;  %s3785_s3 = smov 64  }
  0x15   :  { %163 = vmatpush.msra.mxu1 %v130_v0  ;;  %v124_v2 = vld [vmem:[#allocation5 + $0x140] sm:$0xff]  ;;  %v129_v3 = vld [vmem:[#allocation5 + $0x168] sm:$0xff]  ;;  %v126_v4 = vld [vmem:[#allocation5 + $0x150] sm:$0xff]  ;;  %s3786_s15 = smov 112   ;;  %s3787_s16 = smov 32   ;;  %vm254_vm0 = vcmask 1047556  }
  0x16   :  { %140 = vmatpush.msra.mxu0 %v129_v3  ;;  %v121_v5 = vld [vmem:[#allocation5 + $0x128] sm:$0xff]  ;;  %v123_v6 = vld [vmem:[#allocation5 + $0x138] sm:$0xff]  ;;  %v118_v7 = vld [vmem:[#allocation5 + $0x110] sm:$0xff]  ;;  %s3788_s17 = smov 80   ;;  %s3789_s18 = smov 96   ;;  %vm1686_vm1 = vcmask 130048  }
  0x17   :  { %164 = vmatpush.msra.mxu1 %v127_v1  ;;  %v120_v8 = vld [vmem:[#allocation5 + $0x120] sm:$0xff]  ;;  %v115_v9 = vld [vmem:[#allocation5 + $0xf8] sm:$0xff]  ;;  %v117_v10 = vld [vmem:[#allocation5 + $0x108] sm:$0xff]  ;;  %s3790_s19 = smov 16   ;;  %vm2103_vm2 = vcmask 64512   ;;  %s3793_s22 = smov [#allocation10]  }
  0x18   :  { %141 = vmatpush.msra.mxu0 %v126_v4  ;;  %v112_v11 = vld [vmem:[#allocation5 + $0xe0] sm:$0xff]  ;;  %v114_v12 = vld [vmem:[#allocation5 + $0xf0] sm:$0xff]  ;;  %v131_v13 = vld [vmem:[#allocation5 + $0x178] sm:$0xff]  ;;  %s3445_s23 = sshll.u32 %s3793_s22, 4  ;;  %s3447_s26 = sshll.u32 %s5667_s5, 4  ;;  %s3446_s23 = int_to_ptr.vmem [resolvable:$true] %s3445_s23  ;;  %s3448_s26 = int_to_ptr.hbm [resolvable:$true] %s3447_s26 }
  0x19   :  { %165 = vmatpush.msra.mxu1 %v124_v2  ;;  %v128_v14 = vld [vmem:[#allocation5 + $0x160] sm:$0xff]  ;;  %v109_v15 = vld [vmem:[#allocation5 + $0xc8] sm:$0xff]  ;;  %v111_v16 = vld [vmem:[#allocation5 + $0xd8] sm:$0xff]  ;;  %186 = vmatpush.msra.mxu2 %v131_v13 }
  0x1a   :  { %142 = vmatpush.msra.mxu0 %v123_v6  ;;  %v125_v17 = vld [vmem:[#allocation5 + $0x148] sm:$0xff]  ;;  %v106_v18 = vld [vmem:[#allocation5 + $0xb0] sm:$0xff]  ;;  %v108_v19 = vld [vmem:[#allocation5 + $0xc0] sm:$0xff] }
  0x1b   :  { %166 = vmatpush.msra.mxu1 %v121_v5  ;;  %187 = vmatpush.msra.mxu2 %v128_v14  ;;  %v122_v20 = vld [vmem:[#allocation5 + $0x130] sm:$0xff]  ;;  %v103_v21 = vld [vmem:[#allocation5 + $0x98] sm:$0xff]  ;;  %v105_v22 = vld [vmem:[#allocation5 + $0xa8] sm:$0xff] }
  0x1c   :  { %143 = vmatpush.msra.mxu0 %v120_v8  ;;  %v119_v23 = vld [vmem:[#allocation5 + $0x118] sm:$0xff]  ;;  %v100_v24 = vld [vmem:[#allocation5 + $0x80] sm:$0xff]  ;;  %v102_v25 = vld [vmem:[#allocation5 + $0x90] sm:$0xff] }
  0x1d   :  { %167 = vmatpush.msra.mxu1 %v118_v7  ;;  %188 = vmatpush.msra.mxu2 %v125_v17  ;;  %v116_v26 = vld [vmem:[#allocation5 + $0x100] sm:$0xff]  ;;  %v97_v27 = vld [vmem:[#allocation5 + $0x68] sm:$0xff]  ;;  %v99_v28 = vld [vmem:[#allocation5 + $0x78] sm:$0xff] }
  0x1e   :  { %144 = vmatpush.msra.mxu0 %v117_v10  ;;  %v113_v29 = vld [vmem:[#allocation5 + $0xe8] sm:$0xff]  ;;  %v94_v30 = vld [vmem:[#allocation5 + $0x50] sm:$0xff]  ;;  %v96_v31 = vld [vmem:[#allocation5 + $0x60] sm:$0xff] }
  0x1f   :  { %168 = vmatpush.msra.mxu1 %v115_v9  ;;  %189 = vmatpush.msra.mxu2 %v122_v20  ;;  %v110_v32 = vld [vmem:[#allocation5 + $0xd0] sm:$0xff]  ;;  %v91_v33 = vld [vmem:[#allocation5 + $0x38] sm:$0xff]  ;;  %v93_v34 = vld [vmem:[#allocation5 + $0x48] sm:$0xff]  ;;  %v3791_v9 = vmov 1983009808  }
  0x20   :  { %145 = vmatpush.msra.mxu0 %v114_v12  ;;  %v107_v35 = vld [vmem:[#allocation5 + $0xb8] sm:$0xff]  ;;  %v88_v36 = vld [vmem:[#allocation5 + $0x20] sm:$0xff]  ;;  %v90_v37 = vld [vmem:[#allocation5 + $0x30] sm:$0xff]  ;;  %v259_v10 = vunpack.c.l.s4 %v3791_v9 }
  0x21   :  { %169 = vmatpush.msra.mxu1 %v112_v11  ;;  %190 = vmatpush.msra.mxu2 %v119_v23  ;;  %v104_v38 = vld [vmem:[#allocation5 + $0xa0] sm:$0xff]  ;;  %v85_v39 = vld [vmem:[#allocation5 + $0x8] sm:$0xff]  ;;  %v87_v40 = vld [vmem:[#allocation5 + $0x18] sm:$0xff] }
  0x22   :  { %146 = vmatpush.msra.mxu0 %v111_v16  ;;  %v82_v41 = vld [vmem:[#allocation2] sm:$0xff]  ;;  %v101_v42 = vld [vmem:[#allocation5 + $0x88] sm:$0xff]  ;;  %v84_v43 = vld [vmem:[#allocation5] sm:$0xff]  ;;  %v3926_v12 = vunpack.c.0.s8 %v259_v10 }
  0x23   :  { %170 = vmatpush.msra.mxu1 %v109_v15  ;;  %191 = vmatpush.msra.mxu2 %v116_v26  ;;  %v98_v44 = vld [vmem:[#allocation5 + $0x70] sm:$0xff]  ;;  %v95_v45 = vld [vmem:[#allocation5 + $0x58] sm:$0xff]  ;;  %v92_v46 = vld [vmem:[#allocation5 + $0x40] sm:$0xff]  ;;  %v3792_v26 = vmov 1934713408  }
  0x24   :  { %147 = vmatpush.msra.mxu0 %v108_v19  ;;  %v83_v47 = vld [vmem:[#allocation2 + $0x8] sm:$0xff]  ;;  %v89_v48 = vld [vmem:[#allocation5 + $0x28] sm:$0xff]  ;;  %v86_v49 = vld [vmem:[#allocation5 + $0x10] sm:$0xff] }
  0x25   :  { %171 = vmatpush.msra.mxu1 %v106_v18  ;;  %192 = vmatpush.msra.mxu2 %v113_v29  ;;  %v132_v50 = vld [vmem:[#allocation8] sm:$0x7] }
  0x26   :  { %148 = vmatpush.msra.mxu0 %v105_v22  ;;  %v135_v51 = vperm.slane %v132_v50, 1  ;;  %v134_v54 = vperm.slane %v132_v50, 0  ;;  %v136_v63 = vperm.slane %v132_v50, 2 }
  0x27   :  { %172 = vmatpush.msra.mxu1 %v103_v21  ;;  %193 = vmatpush.msra.mxu2 %v110_v32 }
  0x28   :  { %149 = vmatpush.msra.mxu0 %v102_v25 }
  0x29   :  { %173 = vmatpush.msra.mxu1 %v100_v24  ;;  %194 = vmatpush.msra.mxu2 %v107_v35 }
  0x2a   :  { %150 = vmatpush.msra.mxu0 %v99_v28 }
  0x2b   :  { %174 = vmatpush.msra.mxu1 %v97_v27  ;;  %195 = vmatpush.msra.mxu2 %v104_v38  ;;  %v307_v27 = vunpack.c.l.s4 %v3792_v26 }
  0x2c   :  { %151 = vmatpush.msra.mxu0 %v96_v31 }
  0x2d   :  { %175 = vmatpush.msra.mxu1 %v94_v30  ;;  %196 = vmatpush.msra.mxu2 %v101_v42 }
  0x2e   :  { %152 = vmatpush.msra.mxu0 %v93_v34 }
  0x2f   :  { %176 = vmatpush.msra.mxu1 %v91_v33  ;;  %197 = vmatpush.msra.mxu2 %v98_v44 }
  0x30   :  { %153 = vmatpush.msra.mxu0 %v90_v37 }
  0x31   :  { %177 = vmatpush.msra.mxu1 %v88_v36  ;;  %198 = vmatpush.msra.mxu2 %v95_v45  ;;  %v3944_v36 = vunpack.c.0.s8 %v307_v27 }
  0x32   :  { %154 = vmatpush.msra.mxu0 %v87_v40 }
  0x33   :  { %178 = vmatpush.msra.mxu1 %v85_v39  ;;  %199 = vmatpush.msra.mxu2 %v92_v46 }
  0x34   :  { %179 = vmatmul.f32.vlgmr.msra.gmra.mxu1 %v82_v41  ;;  %155 = vmatpush.msra.mxu0 %v84_v43 }
  0x35   :  { %156 = vmatmul.f32.vlgmr.msra.gmra.mxu0 %v82_v41  ;;  %200 = vmatpush.msra.mxu2 %v89_v48 }
  0x37   :  { %201 = vmatpush.msra.mxu2 %v86_v49 }
  0x38   :  { %202 = vmatmul.f32.vlgmr.msra.gmra.mxu2 %v82_v41 }
  0x3c   :  { %182 = vmatmul.f32.gmra.mxu1 %v83_v47 }
  0x3d   :  { %159 = vmatmul.f32.gmra.mxu0 %v83_v47 }
  0x40   :  { %205 = vmatmul.f32.gmra.mxu2 %v83_v47 }
  0xb1   :  { %v180_v52 = vpop.f32.mrf.mxu1 }
  0xb2   :  { %v3842_v53 = vadd.f32 %v180_v52, %v135_v51  ;;  %v157_v55 = vpop.f32.mrf.mxu0 }
  0xb3   :  { %v3856_v56 = vadd.f32 %v157_v55, %v134_v54 }
  0xb4   :  { %728 = vrot.lane.b32.xlu2 %v3842_v53, %s3784_s2  ;;  %722 = vrot.lane.b32.xlu1 %v3842_v53, %s3785_s3  ;;  %v748_v14 = vrot.slane %v3842_v53, 4 }
  0xb5   :  { %704 = vrot.lane.b32.xlu0 %v3842_v53, %s3786_s15  ;;  %v256_v42 = vrot.slane %v3856_v56, 4 }
  0xb9   :  { %v183_v57 = vpop.f32.mrf.mxu1 }
  0xba   :  { %v3870_v58 = vadd.f32 %v183_v57, %v135_v51  ;;  %v160_v59 = vpop.f32.mrf.mxu0 }
  0xbb   :  { %v3884_v60 = vadd.f32 %v160_v59, %v134_v54  ;;  %v203_v61 = vpop.f32.mrf.mxu2 }
  0xbc   :  { %734 = vrot.lane.b32.xlu2 %v3842_v53, %s3787_s16  ;;  %716 = vrot.lane.b32.xlu1 %v3842_v53, %s3788_s17  ;;  %v3908_v2 = vadd.f32 %v203_v61, %v136_v63  ;;  %v860_v49 = vrot.slane %v3870_v58, 4 }
  0xbd   :  { %710 = vrot.lane.b32.xlu0 %v3842_v53, %s3789_s18 }
  0xc3   :  { %v206_v1 = vpop.f32.mrf.mxu2 }
  0xc4   :  { %229 = vrot.lane.b32.xlu2 %v3856_v56, %s3785_s3  ;;  %217 = vrot.lane.b32.xlu1 %v3856_v56, %s3789_s18  ;;  %v3910_v3 = vadd.f32 %v206_v1, %v136_v63 }
  0xc5   :  { %211 = vrot.lane.b32.xlu0 %v3856_v56, %s3786_s15 }
  0xc6   :  { %v3914_v4 = vpack.i.bf16 %v3910_v3, %v3908_v2 }
  0xcc   :  { %235 = vrot.lane.b32.xlu2 %v3856_v56, %s3784_s2  ;;  %223 = vrot.lane.b32.xlu1 %v3856_v56, %s3788_s17 }
  0xcd   :  { %740 = vrot.lane.b32.xlu0 %v3842_v53, %s3790_s19 }
  0xd4   :  { %706 = vrot.lane.b32.xlu2 %v3870_v58, %s3786_s15  ;;  %247 = vrot.lane.b32.xlu1 %v3856_v56, %s3790_s19 }
  0xd5   :  { %241 = vrot.lane.b32.xlu0 %v3856_v56, %s3787_s16 }
  0xdc   :  { %718 = vrot.lane.b32.xlu2 %v3870_v58, %s3788_s17  ;;  %724 = vrot.lane.b32.xlu1 %v3870_v58, %s3785_s3 }
  0xdd   :  { %712 = vrot.lane.b32.xlu0 %v3870_v58, %s3789_s18 }
  0xe4   :  { %213 = vrot.lane.b32.xlu2 %v3884_v60, %s3786_s15  ;;  %736 = vrot.lane.b32.xlu1 %v3870_v58, %s3787_s16 }
  0xe5   :  { %730 = vrot.lane.b32.xlu0 %v3870_v58, %s3784_s2 }
  0xec   :  { %742 = vrot.lane.b32.xlu2 %v3870_v58, %s3790_s19  ;;  %231 = vrot.lane.b32.xlu1 %v3884_v60, %s3785_s3 }
  0xed   :  { %219 = vrot.lane.b32.xlu0 %v3884_v60, %s3789_s18 }
  0xf4   :  { %243 = vrot.lane.b32.xlu2 %v3884_v60, %s3787_s16  ;;  %237 = vrot.lane.b32.xlu1 %v3884_v60, %s3784_s2 }
  0xf5   :  { %225 = vrot.lane.b32.xlu0 %v3884_v60, %s3788_s17 }
  0xfc   :  { %3529 = vrot.lane.b32.xlu1 %v3914_v4, %s3789_s18  ;;  %3534 = vrot.lane.b32.xlu2 %v3914_v4, %s3786_s15 }
  0xfd   :  { %249 = vrot.lane.b32.xlu0 %v3884_v60, %s3790_s19 }
 0x104   :  { %3544 = vrot.lane.b32.xlu1 %v3914_v4, %s3788_s17  ;;  %3549 = vrot.lane.b32.xlu2 %v3914_v4, %s3787_s16 }
 0x105   :  { %3539 = vrot.lane.b32.xlu0 %v3914_v4, %s3785_s3 }
 0x10c   :  { %3559 = vrot.lane.b32.xlu1 %v3914_v4, %s3790_s19 }
 0x10d   :  { %3554 = vrot.lane.b32.xlu0 %v3914_v4, %s3784_s2 }
 0x10e   :  { %v3906_v62 = vpop.permute.xlu2 %728 }
 0x10f   :  { %v784_v61 = vrot.slane %v3906_v62, 4 }
 0x116   :  { %v735_v0 = vpop.permute.xlu2 %734 }
 0x117   :  { %v770_v32 = vrot.slane %v735_v0, 4 }
 0x11e   :  { %v3916_v5 = vpop.permute.xlu2 %229 }
 0x11f   :  { %v280_v63 = vrot.slane %v3916_v5, 4 }
 0x126   :  { %v723_v6 = vpop.permute.xlu1 %722  ;;  %v3920_v7 = vpop.permute.xlu2 %235 }
 0x127   :  { %v705_v8 = vpop.permute.xlu0 %704  ;;  %v772_v24 = vrot.slane %v723_v6, 4  ;;  %v771_v34 = vsel %vm254_vm0, %v770_v32, %v723_v6 }
 0x128   :  { %v760_v11 = vrot.slane %v705_v8, 4  ;;  %v3951_v46 = vperm.slane %v771_v34, %v3926_v12 }
 0x129   :  { %v773_v35 = vsel %vm254_vm0, %v735_v0, %v772_v24  ;;  %v292_v0 = vrot.slane %v3920_v7, 4 }
 0x12a   :  { %v781_v47 = vperm.slane %v773_v35, %v3926_v12  ;;  %v820_v6 = vrot.slane %v3951_v46, 4 }
 0x12e   :  { %v717_v13 = vpop.permute.xlu1 %716  ;;  %v707_v15 = vpop.permute.xlu2 %706 }
 0x12f   :  { %v758_v16 = vrot.slane %v717_v13, 4  ;;  %v761_v17 = vsel %vm254_vm0, %v717_v13, %v760_v11  ;;  %v711_v18 = vpop.permute.xlu0 %710  ;;  %v872_v52 = vrot.slane %v707_v15, 4 }
 0x130   :  { %v769_v19 = vperm.slane %v761_v17, %v3926_v12  ;;  %v746_v20 = vrot.slane %v711_v18, 4  ;;  %v749_v21 = vsel %vm254_vm0, %v711_v18, %v748_v14 }
 0x131   :  { %v759_v22 = vsel %vm254_vm0, %v758_v16, %v705_v8  ;;  %v757_v23 = vperm.slane %v749_v21, %v3926_v12  ;;  %v832_v8 = vrot.slane %v781_v47, 4 }
 0x132   :  { %v765_v25 = vperm.slane %v759_v22, %v3926_v12  ;;  %v747_v28 = vsel %vm254_vm0, %v746_v20, %v3842_v53  ;;  %v806_v29 = vrot.slane %v769_v19, 4 }
 0x133   :  { %v753_v30 = vperm.slane %v747_v28, %v3926_v12  ;;  %v808_v31 = vrot.slane %v757_v23, 4 }
 0x134   :  { %v794_v33 = vrot.slane %v765_v25, 4  ;;  %v807_v40 = vsel %vm254_vm0, %v806_v29, %v757_v23 }
 0x135   :  { %v796_v39 = vrot.slane %v753_v30, 4  ;;  %v809_v41 = vsel %vm254_vm0, %v769_v19, %v808_v31  ;;  %v3957_v50 = vperm.slane %v807_v40, %v3944_v36 }
 0x136   :  { %v719_v37 = vpop.permute.xlu2 %718  ;;  %v218_v38 = vpop.permute.xlu1 %217  ;;  %v795_v44 = vsel %vm254_vm0, %v794_v33, %v753_v30  ;;  %v3960_v51 = vperm.slane %v809_v41, %v3944_v36 }
 0x137   :  { %v212_v43 = vpop.permute.xlu0 %211  ;;  %v253_v45 = vrot.slane %v218_v38, 4  ;;  %v257_v48 = vsel %vm254_vm0, %v218_v38, %v256_v42  ;;  %v797_v54 = vsel %vm254_vm0, %v765_v25, %v796_v39  ;;  %v3966_v55 = vperm.slane %v795_v44, %v3944_v36 }
 0x138   :  { %v870_v57 = vrot.slane %v719_v37, 4  ;;  %v265_v1 = vperm.slane %v257_v48, %v3926_v12  ;;  %v268_v9 = vrot.slane %v212_v43, 4  ;;  %v3976_v10 = vperm.slane %v797_v54, %v3944_v36 }
 0x139   :  { %v255_v53 = vsel %vm254_vm0, %v253_v45, %v3856_v56  ;;  %v852_v11 = vrot.slane %v3957_v50, 4  ;;  %v856_v13 = vrot.slane %v3960_v51, 4  ;;  %v873_v14 = vsel %vm254_vm0, %v719_v37, %v872_v52 }
 0x13a   :  { %v261_v56 = vperm.slane %v255_v53, %v3926_v12  ;;  %v844_v18 = vrot.slane %v3966_v55, 4  ;;  %v871_v19 = vsel %vm254_vm0, %v870_v57, %v707_v15  ;;  %v316_v23 = vrot.slane %v265_v1, 4 }
 0x13b   :  { %v3989_v27 = vperm.slane %v873_v14, %v3926_v12  ;;  %v3998_v34 = vperm.slane %v871_v19, %v3926_v12  ;;  %v848_v57 = vrot.slane %v3976_v10, 4 }
 0x13c   :  { %v304_v28 = vrot.slane %v261_v56, 4 }
 0x13d   :  { %v906_v14 = vrot.slane %v3998_v34, 4 }
 0x13e   :  { %v3981_v16 = vpop.permute.xlu2 %213  ;;  %v224_v17 = vpop.permute.xlu1 %223 }
 0x13f   :  { %v266_v20 = vrot.slane %v224_v17, 4  ;;  %v269_v21 = vsel %vm254_vm0, %v224_v17, %v268_v9  ;;  %v741_v22 = vpop.permute.xlu0 %740 }
 0x140   :  { %v277_v24 = vperm.slane %v269_v21, %v3926_v12  ;;  %v782_v25 = vrot.slane %v741_v22, 4  ;;  %v785_v26 = vsel %vm254_vm0, %v741_v22, %v784_v61  ;;  %v918_v61 = vrot.slane %v3989_v27, 4 }
 0x141   :  { %v267_v29 = vsel %vm254_vm0, %v266_v20, %v212_v43  ;;  %v793_v30 = vperm.slane %v785_v26, %v3926_v12 }
 0x142   :  { %v273_v15 = vperm.slane %v267_v29, %v3926_v12  ;;  %v314_v31 = vrot.slane %v277_v24, 4  ;;  %v317_v32 = vsel %vm254_vm0, %v277_v24, %v316_v23  ;;  %v783_v33 = vsel %vm254_vm0, %v782_v25, %v3906_v62 }
 0x143   :  { %v789_v35 = vperm.slane %v783_v33, %v3926_v12  ;;  %v830_v37 = vrot.slane %v793_v30, 4  ;;  %v833_v38 = vsel %vm254_vm0, %v793_v30, %v832_v8  ;;  %v4012_v44 = vperm.slane %v317_v32, %v3944_v36 }
 0x144   :  { %v302_v39 = vrot.slane %v273_v15, 4  ;;  %v305_v40 = vsel %vm254_vm0, %v273_v15, %v304_v28  ;;  %v315_v41 = vsel %vm254_vm0, %v314_v31, %v265_v1  ;;  %v841_v42 = vperm.slane %v833_v38, %v3944_v36 }
 0x145   :  { %v4006_v43 = vperm.slane %v305_v40, %v3944_v36  ;;  %v4009_v62 = vperm.slane %v315_v41, %v3944_v36  ;;  %v818_v45 = vrot.slane %v789_v35, 4  ;;  %v821_v52 = vsel %vm254_vm0, %v789_v35, %v820_v6 }
 0x146   :  { %v303_v48 = vsel %vm254_vm0, %v302_v39, %v261_v56  ;;  %v831_v53 = vsel %vm254_vm0, %v830_v37, %v781_v47  ;;  %v854_v54 = vrot.slane %v841_v42, 4  ;;  %v4033_v17 = vpop.permute.xlu2 %742  ;;  %v248_v19 = vpop.permute.xlu1 %247  ;;  %v829_v22 = vperm.slane %v821_v52, %v3944_v36 }
 0x147   :  { %v4020_v1 = vperm.slane %v303_v48, %v3944_v36  ;;  %v819_v8 = vsel %vm254_vm0, %v818_v45, %v3951_v46  ;;  %v242_v9 = vpop.permute.xlu0 %241  ;;  %v4027_v6 = vperm.slane %v831_v53, %v3944_v36  ;;  %v356_v21 = vrot.slane %v4006_v43, 4 }
 0x148   :  { %v825_v56 = vperm.slane %v819_v8, %v3944_v36  ;;  %v4031_v47 = vsel %vm254_vm0, %v854_v54, %v3960_v51  ;;  %v364_v46 = vrot.slane %v4012_v44, 4  ;;  %v360_v24 = vrot.slane %v4009_v62, 4 }
 0x149   :  { %v352_v23 = vrot.slane %v4020_v1, 4  ;;  %v4042_v25 = vsel %vm254_vm0, %v841_v42, %v856_v13  ;;  %v994_v51 = vrot.slane %v4031_v47, 4  ;;  %v894_v28 = vrot.slane %v4033_v17, 4 }
 0x14a   :  { %v842_v26 = vrot.slane %v825_v56, 4  ;;  %v290_v29 = vrot.slane %v248_v19, 4  ;;  %v293_v30 = vsel %vm254_vm0, %v248_v19, %v292_v0  ;;  %v4051_v15 = vsel %vm254_vm0, %v4027_v6, %v852_v11 }
 0x14b   :  { %v301_v31 = vperm.slane %v293_v30, %v3926_v12  ;;  %v278_v32 = vrot.slane %v242_v9, 4  ;;  %v281_v13 = vsel %vm254_vm0, %v242_v9, %v280_v63  ;;  %v846_v33 = vrot.slane %v829_v22, 4 }
 0x14c   :  { %v4058_v35 = vsel %vm254_vm0, %v829_v22, %v848_v57  ;;  %v291_v37 = vsel %vm254_vm0, %v290_v29, %v3920_v7  ;;  %v289_v0 = vperm.slane %v281_v13, %v3926_v12  ;;  %v850_v38 = vrot.slane %v4027_v6, 4 }
 0x14d   :  { %v297_v11 = vperm.slane %v291_v37, %v3926_v12  ;;  %v338_v39 = vrot.slane %v301_v31, 4  ;;  %v279_v40 = vsel %vm254_vm0, %v278_v32, %v3916_v5  ;;  %v1006_v41 = vrot.slane %v4042_v25, 4 }
 0x14e   :  { %v1008_v63 = vrot.slane %v4051_v15, 4  ;;  %v285_v42 = vperm.slane %v279_v40, %v3926_v12  ;;  %v340_v45 = vrot.slane %v289_v0, 4  ;;  %v4073_v54 = vsel %vm254_vm0, %v842_v26, %v3966_v55  ;;  %v4082_v22 = vpop.permute.xlu1 %724 }
 0x14f   :  { %v713_v48 = vpop.permute.xlu0 %712  ;;  %v326_v52 = vrot.slane %v297_v11, 4  ;;  %v339_v7 = vsel %vm254_vm0, %v338_v39, %v289_v0  ;;  %v4088_v26 = vsel %vm254_vm0, %v846_v33, %v3976_v10  ;;  %v884_v10 = vrot.slane %v4082_v22, 4 }
 0x150   :  { %v858_v53 = vrot.slane %v713_v48, 4  ;;  %v328_v57 = vrot.slane %v285_v42, 4  ;;  %v341_v8 = vsel %vm254_vm0, %v301_v31, %v340_v45  ;;  %v345_v5 = vperm.slane %v339_v7, %v3944_v36 }
 0x151   :  { %v861_v9 = vsel %vm254_vm0, %v713_v48, %v860_v49  ;;  %v327_v6 = vsel %vm254_vm0, %v326_v52, %v285_v42  ;;  %v349_v19 = vperm.slane %v341_v8, %v3944_v36  ;;  %v4120_v42 = vsel %vm254_vm0, %v850_v38, %v3957_v50 }
 0x152   :  { %v859_v29 = vsel %vm254_vm0, %v858_v53, %v3870_v58  ;;  %v329_v30 = vsel %vm254_vm0, %v297_v11, %v328_v57  ;;  %v4092_v31 = vperm.slane %v327_v6, %v3944_v36  ;;  %v358_v32 = vrot.slane %v345_v5, 4 }
 0x153   :  { %v4095_v49 = vsel %vm254_vm0, %v345_v5, %v360_v24  ;;  %v4098_v13 = vperm.slane %v329_v30, %v3944_v36  ;;  %v362_v37 = vrot.slane %v349_v19, 4  ;;  %v4101_v0 = vsel %vm254_vm0, %v349_v19, %v364_v46 }
 0x154   :  { %v869_v58 = vperm.slane %v861_v9, %v3926_v12  ;;  %v865_v33 = vperm.slane %v859_v29, %v3926_v12  ;;  %v4109_v11 = vsel %vm254_vm0, %v825_v56, %v844_v18  ;;  %v970_v24 = vrot.slane %v4088_v26, 4 }
 0x155   :  { %v350_v39 = vrot.slane %v4092_v31, 4  ;;  %v4115_v40 = vsel %vm254_vm0, %v358_v32, %v4009_v62  ;;  %v354_v45 = vrot.slane %v4098_v13, 4  ;;  %v514_v55 = vrot.slane %v4101_v0, 4 }
 0x156   :  { %v907_v18 = vsel %vm254_vm0, %v906_v14, %v865_v33  ;;  %v908_v56 = vrot.slane %v865_v33, 4  ;;  %v4129_v48 = vsel %vm254_vm0, %v362_v37, %v4012_v44  ;;  %v919_v50 = vsel %vm254_vm0, %v918_v61, %v869_v58  ;;  %v737_v30 = vpop.permute.xlu1 %736 }
 0x157   :  { %v4132_v62 = vperm.slane %v907_v18, %v3944_v36  ;;  %v920_v38 = vrot.slane %v869_v58, 4  ;;  %v4141_v52 = vsel %vm254_vm0, %v4098_v13, %v356_v21  ;;  %v4146_v44 = vperm.slane %v919_v50, %v3944_v36  ;;  %v731_v32 = vpop.permute.xlu0 %730 }
 0x158   :  { %v909_v14 = vsel %vm254_vm0, %v3998_v34, %v908_v56  ;;  %v971_v7 = vsel %vm254_vm0, %v970_v24, %v4073_v54  ;;  %v982_v21 = vrot.slane %v4058_v35, 4  ;;  %v502_v8 = vrot.slane %v4129_v48, 4 }
 0x159   :  { %v4152_v61 = vperm.slane %v909_v14, %v3944_v36  ;;  %v921_v57 = vsel %vm254_vm0, %v3989_v27, %v920_v38  ;;  %v4160_v34 = vsel %vm254_vm0, %v514_v55, %v4095_v49  ;;  %v972_v5 = vrot.slane %v4073_v54, 4 }
 0x15a   :  { %v995_v9 = vsel %vm254_vm0, %v994_v51, %v4120_v42  ;;  %v4168_v6 = vperm.slane %v921_v57, %v3944_v36  ;;  %v956_v27 = vrot.slane %v4132_v62, 4  ;;  %v4172_v19 = vperm.slane %v971_v7, %v3926_v12 }
 0x15b   :  { %v983_v29 = vsel %vm254_vm0, %v982_v21, %v4109_v11  ;;  %v964_v54 = vrot.slane %v4146_v44, 4  ;;  %v984_v37 = vrot.slane %v4109_v11, 4  ;;  %v1007_v51 = vsel %vm254_vm0, %v1006_v41, %v4051_v15 }
 0x15c   :  { %v4179_v58 = vperm.slane %v983_v29, %v3926_v12  ;;  %v960_v33 = vrot.slane %v4152_v61, 4  ;;  %v996_v24 = vrot.slane %v4120_v42, 4  ;;  %v4188_v55 = vperm.slane %v995_v9, %v3926_v12 }
 0x15d   :  { %v4191_v18 = vperm.slane %v1007_v51, %v3926_v12  ;;  %v882_v56 = vrot.slane %v737_v30, 4  ;;  %v885_v50 = vsel %vm254_vm0, %v737_v30, %v884_v10  ;;  %v895_v38 = vsel %vm254_vm0, %v894_v28, %v731_v32  ;;  %v4225_v30 = vpop.permute.xlu2 %243 }
 0x15e   :  { %v1018_v11 = vrot.slane %v4179_v58, 4  ;;  %v893_v14 = vperm.slane %v885_v50, %v3926_v12  ;;  %v896_v42 = vrot.slane %v731_v32, 4  ;;  %v901_v7 = vperm.slane %v895_v38, %v3926_v12 }
 0x15f   :  { %v1042_v41 = vrot.slane %v4191_v18, 4  ;;  %v968_v57 = vrot.slane %v4168_v6, 4  ;;  %v1020_v9 = vrot.slane %v4172_v19, 4  ;;  %v883_v10 = vsel %vm254_vm0, %v882_v56, %v4082_v22 }
 0x160   :  { %v1019_v21 = vsel %vm254_vm0, %v1018_v11, %v4172_v19  ;;  %v889_v32 = vperm.slane %v883_v10, %v3926_v12  ;;  %v944_v50 = vrot.slane %v893_v14, 4  ;;  %v897_v11 = vsel %vm254_vm0, %v4033_v17, %v896_v42 }
 0x161   :  { %v1025_v29 = vperm.slane %v1019_v21, %v3944_v36  ;;  %v1043_v28 = vsel %vm254_vm0, %v1042_v41, %v4188_v55  ;;  %v930_v38 = vrot.slane %v901_v7, 4  ;;  %v905_v22 = vperm.slane %v897_v11, %v3926_v12 }
 0x162   :  { %v1049_v51 = vperm.slane %v1043_v28, %v3944_v36  ;;  %v932_v46 = vrot.slane %v889_v32, 4  ;;  %v973_v41 = vsel %vm254_vm0, %v4088_v26, %v972_v5  ;;  %v985_v10 = vsel %vm254_vm0, %v4058_v35, %v984_v37 }
 0x163   :  { %v1068_v20 = vrot.slane %v1025_v29, 4  ;;  %v931_v21 = vsel %vm254_vm0, %v930_v38, %v889_v32  ;;  %v942_v42 = vrot.slane %v905_v22, 4  ;;  %v945_v32 = vsel %vm254_vm0, %v905_v22, %v944_v50 }
 0x164   :  { %v1066_v56 = vrot.slane %v1049_v51, 4  ;;  %v933_v53 = vsel %vm254_vm0, %v901_v7, %v932_v46  ;;  %v937_v17 = vperm.slane %v931_v21, %v3944_v36  ;;  %v997_v26 = vsel %vm254_vm0, %v4031_v47, %v996_v24 }
 0x165   :  { %v1069_v28 = vsel %vm254_vm0, %v1049_v51, %v1068_v20  ;;  %v941_v11 = vperm.slane %v933_v53, %v3944_v36  ;;  %v943_v20 = vsel %vm254_vm0, %v942_v42, %v893_v14  ;;  %v953_v35 = vperm.slane %v945_v32, %v3944_v36 }
 0x166   :  { %v1067_v59 = vsel %vm254_vm0, %v1066_v56, %v1025_v29  ;;  %v954_v46 = vrot.slane %v937_v17, 4  ;;  %v4235_v5 = vsel %vm254_vm0, %v937_v17, %v956_v27  ;;  %v949_v37 = vperm.slane %v943_v20, %v3944_v36 }
 0x167   :  { %3462 = vmatpush.xpose.msk.msra.mxu3 %vm1686_vm1, %v1067_v59  ;;  %v958_v53 = vrot.slane %v941_v11, 4  ;;  %v4240_v7 = vsel %vm254_vm0, %v941_v11, %v960_v33  ;;  %v1096_v47 = vrot.slane %v4235_v5, 4  ;;  %v390_v59 = vrot.slane %v4225_v30, 4 }
 0x168   :  { %v4246_v24 = vsel %vm254_vm0, %v954_v46, %v4132_v62  ;;  %v966_v14 = vrot.slane %v953_v35, 4  ;;  %v4249_v27 = vperm.slane %v973_v41, %v3926_v12  ;;  %v962_v51 = vrot.slane %v949_v37, 4 }
 0x169   :  { %v4253_v29 = vsel %vm254_vm0, %v958_v53, %v4152_v61  ;;  %v4256_v33 = vsel %vm254_vm0, %v953_v35, %v968_v57  ;;  %v4259_v50 = vperm.slane %v997_v26, %v3926_v12  ;;  %v1097_v62 = vsel %vm254_vm0, %v4240_v7, %v1096_v47 }
 0x16a   :  { %v4263_v38 = vsel %vm254_vm0, %v966_v14, %v4168_v6  ;;  %v4268_v22 = vperm.slane %v985_v10, %v3926_v12  ;;  %v1009_v61 = vsel %vm254_vm0, %v4042_v25, %v1008_v63  ;;  %v4276_v57 = vsel %vm254_vm0, %v962_v51, %v4146_v44 }
 0x16b   :  { %3464 = vmatpush.xpose.msk.msrb.mxu3 %vm1686_vm1, %v1069_v28  ;;  %v4281_v6 = vsel %vm254_vm0, %v949_v37, %v964_v54  ;;  %v1084_v56 = vrot.slane %v4246_v24, 4  ;;  %v1094_v21 = vrot.slane %v4240_v7, 4  ;;  %v1082_v41 = vrot.slane %v4253_v29, 4  ;;  %v220_v28 = vpop.permute.xlu0 %219 }
 0x16c   :  { %v4287_v15 = vperm.slane %v1097_v62, %v3926_v12  ;;  %v1118_v25 = vrot.slane %v4256_v33, 4  ;;  %v1032_v63 = vrot.slane %v4249_v27, 4  ;;  %v1106_v10 = vrot.slane %v4263_v38, 4 }
 0x16d   :  { %v4293_v44 = vperm.slane %v1009_v61, %v3926_v12  ;;  %v1056_v54 = vrot.slane %v4259_v50, 4  ;;  %v1108_v17 = vrot.slane %v4276_v57, 4  ;;  %v1120_v42 = vrot.slane %v4281_v6, 4 }
 0x16e   :  { %v1033_v11 = vsel %vm254_vm0, %v4268_v22, %v1032_v63  ;;  %v355_v32 = vsel %vm254_vm0, %v354_v45, %v4006_v43  ;;  %v351_v35 = vsel %vm254_vm0, %v350_v39, %v4020_v1  ;;  %v353_v43 = vsel %vm254_vm0, %v4092_v31, %v352_v23 }
 0x16f   :  { %v1041_v26 = vperm.slane %v1033_v11, %v3944_v36  ;;  %v1057_v20 = vsel %vm254_vm0, %v4293_v44, %v1056_v54  ;;  %v478_v46 = vrot.slane %v355_v32, 4  ;;  %v490_v13 = vrot.slane %v4141_v52, 4  ;;  %v232_v54 = vpop.permute.xlu1 %231 }
 0x170   :  { %v1065_v37 = vperm.slane %v1057_v20, %v3944_v36  ;;  %v503_v45 = vsel %vm254_vm0, %v502_v8, %v4115_v40  ;;  %v4329_v14 = vperm.slane %v4160_v34, %v3926_v12  ;;  %v1030_v1 = vrot.slane %v4268_v22, 4 }
 0x171   :  { %v1080_v53 = vrot.slane %v1041_v26, 4  ;;  %v479_v47 = vsel %vm254_vm0, %v478_v46, %v351_v35  ;;  %v4325_v39 = vperm.slane %v503_v45, %v3926_v12  ;;  %v480_v31 = vrot.slane %v351_v35, 4 }
 0x172   :  { %v1078_v23 = vrot.slane %v1065_v37, 4  ;;  %v491_v51 = vsel %vm254_vm0, %v490_v13, %v353_v43  ;;  %v4335_v8 = vperm.slane %v479_v47, %v3926_v12  ;;  %v550_v63 = vrot.slane %v4329_v14, 4 }
 0x173   :  { %v1081_v62 = vsel %vm254_vm0, %v1065_v37, %v1080_v53  ;;  %v4338_v61 = vperm.slane %v491_v51, %v3926_v12  ;;  %v4343_v34 = vsel %vm254_vm0, %v4256_v33, %v1120_v42  ;;  %v1021_v20 = vsel %vm254_vm0, %v4179_v58, %v1020_v9  ;;  %v226_v47 = vpop.permute.xlu0 %225 }
 0x174   :  { %v1079_v11 = vsel %vm254_vm0, %v1078_v23, %v1041_v26  ;;  %3476 = vmatpush.xpose.msk.msrb.mxu1 %vm1686_vm1, %v1081_v62  ;;  %v5668_v35 = vrot.slane %v4188_v55, 4  ;;  %v492_v37 = vrot.slane %v353_v43, 4  ;;  %v551_v26 = vsel %vm254_vm0, %v550_v63, %v4325_v39 }
 0x175   :  { %3474 = vmatpush.xpose.msk.msrb.mxu0 %vm1686_vm1, %v1079_v11  ;;  %v526_v42 = vrot.slane %v4338_v61, 4  ;;  %v557_v19 = vperm.slane %v551_v26, %v3944_v36  ;;  %v391_v45 = vsel %vm254_vm0, %v390_v59, %v232_v54  ;;  %v392_v58 = vrot.slane %v232_v54, 4 }
 0x176   :  { %v1045_v46 = vsel %vm254_vm0, %v4191_v18, %v5668_v35  ;;  %v366_v9 = vrot.slane %v220_v28, 4  ;;  %v1029_v18 = vperm.slane %v1021_v20, %v3944_v36  ;;  %v481_v43 = vsel %vm254_vm0, %v355_v32, %v480_v31 }
 0x177   :  { %v1053_v13 = vperm.slane %v1045_v46, %v3944_v36  ;;  %v527_v55 = vsel %vm254_vm0, %v526_v42, %v4335_v8  ;;  %v1054_v23 = vrot.slane %v4293_v44, 4  ;;  %v574_v62 = vrot.slane %v557_v19, 4 }
 0x178   :  { %v533_v51 = vperm.slane %v527_v55, %v3944_v36  ;;  %v5669_v63 = vrot.slane %v3884_v60, 4  ;;  %v528_v54 = vrot.slane %v4335_v8, 4  ;;  %v552_v11 = vrot.slane %v4325_v39, 4 }
 0x179   :  { %v1070_v53 = vrot.slane %v1053_v13, 4  ;;  %v4374_v35 = vperm.slane %v391_v45, %v3926_v12  ;;  %v367_v32 = vsel %vm254_vm0, %v366_v9, %v3884_v60  ;;  %v393_v20 = vsel %vm254_vm0, %v4225_v30, %v392_v58 }
 0x17a   :  { %v369_v59 = vsel %vm254_vm0, %v220_v28, %v5669_v63  ;;  %v575_v31 = vsel %vm254_vm0, %v574_v62, %v533_v51  ;;  %v4382_v46 = vperm.slane %v481_v43, %v3926_v12  ;;  %v493_v28 = vsel %vm254_vm0, %v4141_v52, %v492_v37 }
 0x17b   :  { %3463 = vmatmul.msk.f32.vlgmr.msra.gmra.mxu3 %vm1686_vm1, %v575_v31  ;;  %v1071_v39 = vsel %vm254_vm0, %v1070_v53, %v1029_v18  ;;  %v373_v8 = vperm.slane %v367_v32, %v3926_v12  ;;  %v377_v42 = vperm.slane %v369_v59, %v3926_v12  ;;  %v5670_v60 = vrot.slane %v4115_v40, 4 }
 0x17c   :  { %3466 = vmatpush.xpose.msk.msra.mxu3 %vm1686_vm1, %v1071_v39  ;;  %v4396_v30 = vperm.slane %v493_v28, %v3926_v12  ;;  %v5671_v37 = vrot.slane %v4095_v49, 4  ;;  %v540_v58 = vrot.slane %v4382_v46, 4  ;;  %v4407_v40 = vperm.slane %v393_v20, %v3926_v12 }
 0x17d   :  { %v505_v26 = vsel %vm254_vm0, %v4129_v48, %v5670_v60  ;;  %v576_v9 = vrot.slane %v533_v51, 4  ;;  %v1072_v43 = vrot.slane %v1029_v18, 4  ;;  %v378_v62 = vrot.slane %v226_v47, 4 }
 0x17e   :  { %v4399_v52 = vperm.slane %v505_v26, %v3926_v12  ;;  %v517_v45 = vsel %vm254_vm0, %v4101_v0, %v5671_v37  ;;  %v541_v55 = vsel %vm254_vm0, %v4396_v30, %v540_v58  ;;  %v416_v49 = vrot.slane %v373_v8, 4  ;;  %v238_v26 = vpop.permute.xlu1 %237  ;;  %v250_v37 = vpop.permute.xlu0 %249 }
 0x17f   :  { %v4410_v48 = vperm.slane %v517_v45, %v3926_v12  ;;  %v428_v63 = vrot.slane %v377_v42, 4  ;;  %v549_v0 = vperm.slane %v541_v55, %v3944_v36  ;;  %v5672_v59 = vrot.slane %v3981_v16, 4 }
 0x180   :  { %v564_v53 = vrot.slane %v4399_v52, 4  ;;  %v577_v31 = vsel %vm254_vm0, %v557_v19, %v576_v9  ;;  %v379_v18 = vsel %vm254_vm0, %v378_v62, %v3981_v16  ;;  %v1073_v60 = vsel %vm254_vm0, %v1053_v13, %v1072_v43 }
 0x181   :  { %v381_v32 = vsel %vm254_vm0, %v226_v47, %v5672_v59  ;;  %v588_v39 = vrot.slane %v549_v0, 4  ;;  %v385_v4 = vperm.slane %v379_v18, %v3926_v12  ;;  %v529_v19 = vsel %vm254_vm0, %v4338_v61, %v528_v54 }
 0x182   :  { %v565_v51 = vsel %vm254_vm0, %v4410_v48, %v564_v53  ;;  %v389_v20 = vperm.slane %v381_v32, %v3926_v12  ;;  %v553_v16 = vsel %vm254_vm0, %v4329_v14, %v552_v11  ;;  %v440_v53 = vrot.slane %v4374_v35, 4 }
 0x183   :  { %v573_v28 = vperm.slane %v565_v51, %v3944_v36  ;;  %3465 = vmatmul.msk.f32.vlgmr.msrb.gmra.mxu3 %vm1686_vm1, %v577_v31  ;;  %v414_v55 = vrot.slane %v385_v4, 4  ;;  %v417_v13 = vsel %vm254_vm0, %v385_v4, %v416_v49  ;;  %v404_v61 = vrot.slane %v238_v26, 4 }
 0x184   :  { %v426_v47 = vrot.slane %v389_v20, 4  ;;  %v429_v45 = vsel %vm254_vm0, %v389_v20, %v428_v63  ;;  %3468 = vmatpush.xpose.msk.msrb.mxu3 %vm1686_vm1, %v1073_v60  ;;  %v402_v54 = vrot.slane %v250_v37, 4  ;;  %v425_v62 = vperm.slane %v417_v13, %v3944_v36 }
 0x185   :  { %v586_v58 = vrot.slane %v573_v28, 4  ;;  %v589_v9 = vsel %vm254_vm0, %v573_v28, %v588_v39  ;;  %v415_v11 = vsel %vm254_vm0, %v414_v55, %v373_v8  ;;  %v437_v63 = vperm.slane %v429_v45, %v3944_v36 }
 0x186   :  { %3477 = vmatmul.msk.f32.vlgmr.msrb.gmra.mxu1 %vm1686_vm1, %v589_v9  ;;  %v427_v43 = vsel %vm254_vm0, %v426_v47, %v377_v42  ;;  %v452_v49 = vrot.slane %v4407_v40, 4  ;;  %v538_v59 = vrot.slane %v4396_v30, 4  ;;  %v4450_v32 = vperm.slane %v529_v19, %v3944_v36 }
 0x187   :  { %v587_v14 = vsel %vm254_vm0, %v586_v58, %v549_v0  ;;  %v4453_v42 = vperm.slane %v553_v16, %v3944_v36  ;;  %v4456_v0 = vperm.slane %v427_v43, %v3944_v36  ;;  %v1031_v8 = vsel %vm254_vm0, %v1030_v1, %v4249_v27 }
 0x188   :  { %3475 = vmatmul.msk.f32.vlgmr.msrb.gmra.mxu0 %vm1686_vm1, %v587_v14  ;;  %v1055_v51 = vsel %vm254_vm0, %v1054_v23, %v4259_v50  ;;  %v403_v31 = vsel %vm254_vm0, %v402_v54, %v238_v26  ;;  %v4468_v18 = vperm.slane %v415_v11, %v3944_v36  ;;  %v4472_v28 = vperm.slane %v1031_v8, %v3944_v36 }
 0x189   :  { %v578_v20 = vrot.slane %v4453_v42, 4  ;;  %v4475_v39 = vperm.slane %v1055_v51, %v3944_v36  ;;  %v468_v22 = vrot.slane %v425_v62, 4  ;;  %v476_v27 = vrot.slane %v437_v63, 4 }
 0x18a   :  { %v405_v1 = vsel %vm254_vm0, %v250_v37, %v404_v61  ;;  %v409_v44 = vperm.slane %v403_v31, %v3926_v12  ;;  %v1083_v4 = vsel %vm254_vm0, %v1082_v41, %v4246_v24  ;;  %v472_v26 = vrot.slane %v4456_v0, 4 }
 0x18b   :  { %v579_v50 = vsel %vm254_vm0, %v578_v20, %v4450_v32  ;;  %v1074_v23 = vrot.slane %v4475_v39, 4  ;;  %v413_v60 = vperm.slane %v405_v1, %v3926_v12  ;;  %v1107_v45 = vsel %vm254_vm0, %v1106_v10, %v4276_v57 }
 0x18c   :  { %3467 = vmatmul.msk.f32.vlgmr.msra.gmra.mxu3 %vm1686_vm1, %v579_v50  ;;  %v438_v47 = vrot.slane %v409_v44, 4  ;;  %v441_v37 = vsel %vm254_vm0, %v409_v44, %v440_v53  ;;  %v4503_v13 = vperm.slane %v1083_v4, %v3926_v12  ;;  %v1095_v10 = vsel %vm254_vm0, %v1094_v21, %v4235_v5 }
 0x18d   :  { %v1075_v19 = vsel %vm254_vm0, %v1074_v23, %v4472_v28  ;;  %v449_v16 = vperm.slane %v441_v37, %v3944_v36  ;;  %v450_v58 = vrot.slane %v413_v60, 4  ;;  %v453_v41 = vsel %vm254_vm0, %v413_v60, %v452_v49 }
 0x18e   :  { %3470 = vmatpush.xpose.msk.msra.mxu3 %vm1686_vm1, %v1075_v19  ;;  %v439_v9 = vsel %vm254_vm0, %v438_v47, %v4374_v35  ;;  %v461_v55 = vperm.slane %v453_v41, %v3944_v36  ;;  %v4515_v54 = vperm.slane %v1107_v45, %v3926_v12  ;;  %v562_v5 = vrot.slane %v4410_v48, 4 }
 0x18f   :  { %v4510_v53 = vperm.slane %v439_v9, %v3944_v36  ;;  %v451_v43 = vsel %vm254_vm0, %v450_v58, %v4407_v40  ;;  %v466_v61 = vrot.slane %v449_v16, 4  ;;  %v4519_v14 = vsel %vm254_vm0, %v449_v16, %v468_v22 }
 0x190   :  { %v457_v35 = vperm.slane %v451_v43, %v3944_v36  ;;  %v474_v11 = vrot.slane %v461_v55, 4  ;;  %v4522_v7 = vsel %vm254_vm0, %v461_v55, %v476_v27  ;;  %v464_v21 = vrot.slane %v4468_v18, 4 }
 0x191   :  { %v626_v49 = vrot.slane %v4522_v7, 4  ;;  %v1119_v40 = vsel %vm254_vm0, %v1118_v25, %v4281_v6  ;;  %v4532_v8 = vsel %vm254_vm0, %v466_v61, %v425_v62  ;;  %v1101_v48 = vperm.slane %v1095_v10, %v3926_v12 }
 0x192   :  { %v4535_v51 = vsel %vm254_vm0, %v457_v35, %v472_v26  ;;  %v4538_v31 = vsel %vm254_vm0, %v474_v11, %v437_v63  ;;  %v462_v20 = vrot.slane %v4510_v53, 4  ;;  %v470_v22 = vrot.slane %v457_v35, 4 }
 0x193   :  { %v602_v27 = vrot.slane %v4519_v14, 4  ;;  %v1132_v33 = vrot.slane %v4503_v13, 4  ;;  %v1125_v6 = vperm.slane %v1119_v40, %v3926_v12  ;;  %v1156_v25 = vrot.slane %v4515_v54, 4 }
 0x194   :  { %v1085_v62 = vsel %vm254_vm0, %v4253_v29, %v1084_v56  ;;  %v1109_v63 = vsel %vm254_vm0, %v4263_v38, %v1108_v17  ;;  %v590_v1 = vrot.slane %v4532_v8, 4  ;;  %v614_v44 = vrot.slane %v4538_v31, 4 }
 0x195   :  { %v4558_v50 = vsel %vm254_vm0, %v626_v49, %v4535_v51  ;;  %v1133_v23 = vsel %vm254_vm0, %v1101_v48, %v1132_v33  ;;  %v628_v24 = vrot.slane %v4535_v51, 4  ;;  %v1157_v29 = vsel %vm254_vm0, %v1125_v6, %v1156_v25 }
 0x196   :  { %v1141_v60 = vperm.slane %v1133_v23, %v3944_v36  ;;  %v1093_v57 = vperm.slane %v1085_v62, %v3926_v12  ;;  %v4567_v38 = vsel %vm254_vm0, %v470_v22, %v4456_v0  ;;  %v1165_v56 = vperm.slane %v1157_v29, %v3944_v36 }
 0x197   :  { %v1117_v17 = vperm.slane %v1109_v63, %v3926_v12  ;;  %v1129_v4 = vperm.slane %v4343_v34, %v3926_v12  ;;  %v1142_v26 = vrot.slane %v4287_v15, 4  ;;  %v580_v45 = vrot.slane %v4450_v32, 4 }
 0x198   :  { %v1184_v47 = vrot.slane %v1141_v60, 4  ;;  %v1144_v37 = vrot.slane %v1093_v57, 4  ;;  %v1182_v19 = vrot.slane %v1165_v56, 4  ;;  %v1076_v41 = vrot.slane %v4472_v28, 4 }
 0x199   :  { %v1166_v16 = vrot.slane %v1129_v4, 4  ;;  %v1168_v58 = vrot.slane %v1117_v17, 4  ;;  %v615_v0 = vsel %vm254_vm0, %v614_v44, %v4567_v38  ;;  %v1143_v9 = vsel %vm254_vm0, %v1142_v26, %v1093_v57 }
 0x19a   :  { %v1185_v55 = vsel %vm254_vm0, %v1165_v56, %v1184_v47  ;;  %v1145_v34 = vsel %vm254_vm0, %v4287_v15, %v1144_v37  ;;  %v1183_v10 = vsel %vm254_vm0, %v1182_v19, %v1141_v60  ;;  %v581_v28 = vsel %vm254_vm0, %v4453_v42, %v580_v45 }
 0x19b   :  { %v1167_v43 = vsel %vm254_vm0, %v1166_v16, %v1117_v17  ;;  %3484 = vmatpush.xpose.msk.msra.mxu1 %vm1686_vm1, %v1185_v55  ;;  %v4586_v32 = vperm.slane %v1145_v34, %v3944_v36  ;;  %3482 = vmatpush.xpose.msk.msra.mxu0 %vm1686_vm1, %v1183_v10  ;;  %v1169_v35 = vsel %vm254_vm0, %v1129_v4, %v1168_v58  ;;  %v1130_v11 = vrot.slane %v1101_v48, 4 }
 0x19c   :  { %v4592_v61 = vperm.slane %v1167_v43, %v3944_v36  ;;  %3469 = vmatmul.msk.f32.vlgmr.msrb.gmra.mxu3 %vm1686_vm1, %v581_v28  ;;  %v1077_v15 = vsel %vm254_vm0, %v4475_v39, %v1076_v41  ;;  %v4599_v49 = vperm.slane %v1169_v35, %v3944_v36  ;;  %v539_v42 = vsel %vm254_vm0, %v538_v59, %v4382_v46 }
 0x19d   :  { %v1192_v40 = vrot.slane %v4586_v32, 4  ;;  %3472 = vmatpush.xpose.msk.msrb.mxu3 %vm1686_vm1, %v1077_v15  ;;  %v563_v51 = vsel %vm254_vm0, %v562_v5, %v4399_v52  ;;  %v4610_v22 = vperm.slane %v1143_v9, %v3944_v36  ;;  %v545_v48 = vperm.slane %v539_v42, %v3944_v36 }
 0x19e   :  { %v1186_v39 = vrot.slane %v4592_v61, 4  ;;  %v569_v33 = vperm.slane %v563_v51, %v3944_v36  ;;  %v1131_v30 = vsel %vm254_vm0, %v1130_v11, %v4503_v13  ;;  %v1154_v62 = vrot.slane %v1125_v6, 4 }
 0x19f   :  { %v1193_v25 = vsel %vm254_vm0, %v4599_v49, %v1192_v40  ;;  %v463_v46 = vsel %vm254_vm0, %v462_v20, %v4468_v18  ;;  %v616_v52 = vrot.slane %v4567_v38, 4  ;;  %v465_v63 = vsel %vm254_vm0, %v4510_v53, %v464_v21 }
 0x1a0   :  { %v1187_v59 = vsel %vm254_vm0, %v1186_v39, %v4610_v22  ;;  %3492 = vmatpush.xpose.msk.msrb.mxu1 %vm1686_vm1, %v1193_v25  ;;  %v582_v5 = vrot.slane %v569_v33, 4  ;;  %v629_v13 = vsel %vm254_vm0, %v4522_v7, %v628_v24  ;;  %v1155_v20 = vsel %vm254_vm0, %v1154_v62, %v4515_v54 }
 0x1a1   :  { %3486 = vmatpush.xpose.msk.msrb.mxu0 %vm1686_vm1, %v1187_v59  ;;  %v591_v6 = vsel %vm254_vm0, %v590_v1, %v463_v46  ;;  %v603_v44 = vsel %vm254_vm0, %v602_v27, %v465_v63  ;;  %v1137_v23 = vperm.slane %v1131_v30, %v3944_v36  ;;  %v1161_v18 = vperm.slane %v1155_v20, %v3944_v36 }
 0x1a2   :  { %v584_v60 = vrot.slane %v545_v48, 4  ;;  %v597_v53 = vperm.slane %v591_v6, %v3926_v12  ;;  %v583_v7 = vsel %vm254_vm0, %v582_v5, %v545_v48  ;;  %v604_v21 = vrot.slane %v465_v63, 4  ;;  %v3530_v6 = vpop.permute.xlu1 %3529 }
 0x1a3   :  { %v621_v24 = vperm.slane %v615_v0, %v3926_v12  ;;  %v633_v54 = vperm.slane %v4558_v50, %v3926_v12  ;;  %v637_v1 = vperm.slane %v629_v13, %v3926_v12  ;;  %v1178_v27 = vrot.slane %v1161_v18, 4 }
 0x1a4   :  { %3471 = vmatmul.msk.f32.vlgmr.msra.gmra.mxu3 %vm1686_vm1, %v583_v7  ;;  %v609_v29 = vperm.slane %v603_v44, %v3926_v12  ;;  %v640_v57 = vrot.slane %v597_v53, 4  ;;  %v617_v38 = vsel %vm254_vm0, %v4538_v31, %v616_v52  ;;  %v592_v4 = vrot.slane %v463_v46, 4 }
 0x1a5   :  { %v664_v56 = vrot.slane %v621_v24, 4  ;;  %v662_v17 = vrot.slane %v633_v54, 4  ;;  %v1179_v26 = vsel %vm254_vm0, %v1178_v27, %v1137_v23  ;;  %v1180_v47 = vrot.slane %v1137_v23, 4 }
 0x1a6   :  { %v641_v37 = vsel %vm254_vm0, %v609_v29, %v640_v57  ;;  %v605_v50 = vsel %vm254_vm0, %v4519_v14, %v604_v21  ;;  %3478 = vmatpush.xpose.msk.msra.mxu3 %vm1686_vm1, %v1179_v26  ;;  %v585_v45 = vsel %vm254_vm0, %v569_v33, %v584_v60  ;;  %v1190_v41 = vrot.slane %v4599_v49, 4 }
 0x1a7   :  { %v649_v19 = vperm.slane %v641_v37, %v3944_v36  ;;  %v665_v16 = vsel %vm254_vm0, %v633_v54, %v664_v56  ;;  %v663_v31 = vsel %vm254_vm0, %v662_v17, %v621_v24  ;;  %v638_v0 = vrot.slane %v609_v29, 4  ;;  %v4701_v54 = vpop.permute.xlu0 %3539 }
 0x1a8   :  { %v673_v58 = vperm.slane %v665_v16, %v3944_v36  ;;  %v593_v9 = vsel %vm254_vm0, %v4532_v8, %v592_v4  ;;  %v613_v34 = vperm.slane %v605_v50, %v3926_v12  ;;  %v625_v10 = vperm.slane %v617_v38, %v3926_v12 }
 0x1a9   :  { %v692_v55 = vrot.slane %v649_v19, 4  ;;  %v601_v14 = vperm.slane %v593_v9, %v3926_v12  ;;  %v1181_v43 = vsel %vm254_vm0, %v1161_v18, %v1180_v47  ;;  %v669_v35 = vperm.slane %v663_v31, %v3944_v36  ;;  %v3535_v31 = vpop.permute.xlu2 %3534 }
 0x1aa   :  { %v690_v28 = vrot.slane %v673_v58, 4  ;;  %v674_v15 = vrot.slane %v637_v1, 4  ;;  %v650_v49 = vrot.slane %v613_v34, 4  ;;  %v676_v42 = vrot.slane %v625_v10, 4  ;;  %v3545_v21 = vpop.permute.xlu1 %3544 }
 0x1ab   :  { %v693_v11 = vsel %vm254_vm0, %v673_v58, %v692_v55  ;;  %v652_v40 = vrot.slane %v601_v14, 4  ;;  %v639_v51 = vsel %vm254_vm0, %v638_v0, %v597_v53  ;;  %v1191_v48 = vsel %vm254_vm0, %v1190_v41, %v4586_v32 }
 0x1ac   :  { %3473 = vmatmul.msk.f32.vlgmr.msrb.gmra.mxu3 %vm1686_vm1, %v585_v45  ;;  %v691_v8 = vsel %vm254_vm0, %v690_v28, %v649_v19  ;;  %3485 = vmatmul.msk.f32.vlgmr.msra.gmra.mxu1 %vm1686_vm1, %v693_v11  ;;  %v675_v39 = vsel %vm254_vm0, %v674_v15, %v625_v10  ;;  %v651_v33 = vsel %vm254_vm0, %v650_v49, %v601_v14  ;;  %v686_v52 = vrot.slane %v669_v35, 4 }
 0x1ad   :  { %3480 = vmatpush.xpose.msk.msrb.mxu3 %vm1686_vm1, %v1181_v43  ;;  %3483 = vmatmul.msk.f32.vlgmr.msra.gmra.mxu0 %vm1686_vm1, %v691_v8  ;;  %v681_v25 = vperm.slane %v675_v39, %v3944_v36  ;;  %v653_v30 = vsel %vm254_vm0, %v613_v34, %v652_v40  ;;  %v677_v62 = vsel %vm254_vm0, %v637_v1, %v676_v42  ;;  %v1188_v32 = vrot.slane %v4610_v22, 4 }
 0x1ae   :  { %3490 = vmatpush.xpose.msk.msra.mxu0 %vm1686_vm1, %v1191_v48  ;;  %v645_v46 = vperm.slane %v639_v51, %v3944_v36  ;;  %v661_v59 = vperm.slane %v653_v30, %v3944_v36  ;;  %v657_v5 = vperm.slane %v651_v33, %v3944_v36  ;;  %v685_v13 = vperm.slane %v677_v62, %v3944_v36 }
 0x1af   :  { %v694_v63 = vrot.slane %v681_v25, 4  ;;  %v1189_v60 = vsel %vm254_vm0, %v4592_v61, %v1188_v32  ;;  %v3531_v1 = vunpack.i.l.bf16 %v3530_v6  ;;  %v3532_v29 = vunpack.i.h.bf16 %v3530_v6  ;;  %v3555_v26 = vpop.permute.xlu0 %3554 }
 0x1b0   :  { %v700_v20 = vrot.slane %v661_v59, 4  ;;  %v687_v44 = vsel %vm254_vm0, %v686_v52, %v645_v46  ;;  %v688_v22 = vrot.slane %v645_v46, 4  ;;  %v698_v53 = vrot.slane %v685_v13, 4 }
 0x1b1   :  { %v695_v18 = vsel %vm254_vm0, %v694_v63, %v657_v5  ;;  %v696_v61 = vrot.slane %v657_v5, 4  ;;  %v1238_v57 = vrot.slane %v3531_v1, 4  ;;  %v3547_v38 = vunpack.i.h.bf16 %v3545_v21 }
 0x1b2   :  { %v701_v23 = vsel %vm254_vm0, %v685_v13, %v700_v20  ;;  %v689_v7 = vsel %vm254_vm0, %v669_v35, %v688_v22  ;;  %v699_v24 = vsel %vm254_vm0, %v698_v53, %v661_v59  ;;  %v3546_v56 = vunpack.i.l.bf16 %v3545_v21  ;;  %v3560_v17 = vpop.permute.xlu1 %3559 }
 0x1b3   :  { %v697_v27 = vsel %vm254_vm0, %v681_v25, %v696_v61  ;;  %v1240_v4 = vrot.slane %v3908_v2, 4  ;;  %v1352_v47 = vrot.slane %v3910_v3, 4  ;;  %v1350_v37 = vrot.slane %v3532_v29, 4 }
 0x1b4   :  { %3479 = vmatmul.msk.f32.vlgmr.msra.gmra.mxu3 %vm1686_vm1, %v687_v44  ;;  %3493 = vmatmul.msk.f32.vlgmr.msrb.gmra.mxu1 %vm1686_vm1, %v701_v23  ;;  %v3561_v50 = vunpack.i.l.bf16 %v3560_v17  ;;  %v1239_v45 = vsel %vm254_vm0, %v1238_v57, %v3908_v2  ;;  %v1362_v19 = vrot.slane %v3547_v38, 4  ;;  %v1250_v16 = vrot.slane %v3546_v56, 4 }
 0x1b5   :  { %3487 = vmatmul.msk.f32.vlgmr.msrb.gmra.mxu0 %vm1686_vm1, %v695_v18  ;;  %3488 = vmatpush.xpose.msk.msra.mxu3 %vm1686_vm1, %v1189_v60  ;;  %v3557_v58 = vunpack.i.h.bf16 %v3555_v26  ;;  %v3556_v41 = vunpack.i.l.bf16 %v3555_v26  ;;  %v1241_v0 = vsel %vm254_vm0, %v3531_v1, %v1240_v4  ;;  %v3537_v9 = vunpack.i.h.bf16 %v3535_v31 }
 0x1b6   :  { %v3536_v55 = vunpack.i.l.bf16 %v3535_v31  ;;  %v3562_v14 = vunpack.i.h.bf16 %v3560_v17  ;;  %v1351_v34 = vsel %vm254_vm0, %v1350_v37, %v3910_v3  ;;  %v1353_v10 = vsel %vm254_vm0, %v3532_v29, %v1352_v47 }
 0x1b7   :  { %v1245_v43 = vperm.slane %v1239_v45, %v3926_v12  ;;  %v1274_v28 = vrot.slane %v3561_v50, 4  ;;  %v1364_v35 = vrot.slane %v3537_v9, 4  ;;  %v1363_v15 = vsel %vm254_vm0, %v1362_v19, %v3537_v9 }
 0x1b8   :  { %v1252_v2 = vrot.slane %v3536_v55, 4  ;;  %v1251_v11 = vsel %vm254_vm0, %v1250_v16, %v3536_v55  ;;  %v1249_v49 = vperm.slane %v1241_v0, %v3926_v12  ;;  %v1388_v42 = vrot.slane %v3557_v58, 4  ;;  %v3550_v16 = vpop.permute.xlu2 %3549 }
 0x1b9   :  { %v1257_v40 = vperm.slane %v1251_v11, %v3926_v12  ;;  %v1276_v8 = vrot.slane %v3556_v41, 4  ;;  %v1365_v51 = vsel %vm254_vm0, %v3547_v38, %v1364_v35  ;;  %v1369_v3 = vperm.slane %v1363_v15, %v3926_v12 }
 0x1ba   :  { %v1253_v39 = vsel %vm254_vm0, %v3546_v56, %v1252_v2  ;;  %v1386_v48 = vrot.slane %v3562_v14, 4  ;;  %v1357_v33 = vperm.slane %v1351_v34, %v3926_v12  ;;  %v1361_v25 = vperm.slane %v1353_v10, %v3926_v12 }
 0x1bb   :  { %v1261_v30 = vperm.slane %v1253_v39, %v3926_v12  ;;  %v1288_v62 = vrot.slane %v1245_v43, 4  ;;  %v1373_v46 = vperm.slane %v1365_v51, %v3926_v12  ;;  %v1286_v52 = vrot.slane %v1257_v40, 4 }
 0x1bc   :  { %3481 = vmatmul.msk.f32.vlgmr.msrb.gmra.mxu3 %vm1686_vm1, %v689_v7  ;;  %v1275_v59 = vsel %vm254_vm0, %v1274_v28, %v3556_v41  ;;  %v3542_v5 = vunpack.i.h.bf16 %v4701_v54  ;;  %v3541_v63 = vunpack.i.l.bf16 %v4701_v54  ;;  %v1277_v32 = vsel %vm254_vm0, %v3561_v50, %v1276_v8 }
 0x1bd   :  { %3491 = vmatmul.msk.f32.vlgmr.msra.gmra.mxu0 %vm1686_vm1, %v699_v24  ;;  %v1300_v13 = vrot.slane %v1249_v49, 4  ;;  %v1398_v20 = vrot.slane %v1369_v3, 4  ;;  %v1387_v6 = vsel %vm254_vm0, %v1386_v48, %v3557_v58  ;;  %v1389_v44 = vsel %vm254_vm0, %v3562_v14, %v1388_v42 }
 0x1be   :  { %v1400_v23 = vrot.slane %v1357_v33, 4  ;;  %v1412_v18 = vrot.slane %v1361_v25, 4  ;;  %v1298_v60 = vrot.slane %v1261_v30, 4  ;;  %v1281_v22 = vperm.slane %v1275_v59, %v3926_v12 }
 0x1bf   :  { %v1410_v53 = vrot.slane %v1373_v46, 4  ;;  %v1287_v7 = vsel %vm254_vm0, %v1286_v52, %v1245_v43  ;;  %v1289_v21 = vsel %vm254_vm0, %v1257_v40, %v1288_v62  ;;  %v1285_v24 = vperm.slane %v1277_v32, %v3926_v12 }
 0x1c0   :  { %v1393_v54 = vperm.slane %v1387_v6, %v3926_v12  ;;  %v1397_v61 = vperm.slane %v1389_v44, %v3926_v12  ;;  %v1376_v1 = vrot.slane %v3542_v5, 4  ;;  %v1301_v29 = vsel %vm254_vm0, %v1261_v30, %v1300_v13 }
 0x1c1   :  { %v1399_v57 = vsel %vm254_vm0, %v1398_v20, %v1357_v33  ;;  %v4740_v38 = vperm.slane %v1287_v7, %v3944_v36  ;;  %v4743_v56 = vperm.slane %v1289_v21, %v3944_v36  ;;  %v1299_v17 = vsel %vm254_vm0, %v1298_v60, %v1249_v49 }
 0x1c2   :  { %v1401_v4 = vsel %vm254_vm0, %v1369_v3, %v1400_v23  ;;  %v1411_v26 = vsel %vm254_vm0, %v1410_v53, %v1361_v25  ;;  %v1413_v47 = vsel %vm254_vm0, %v1373_v46, %v1412_v18  ;;  %v1310_v37 = vrot.slane %v1281_v22, 4 }
 0x1c3   :  { %v1322_v50 = vrot.slane %v1285_v24, 4  ;;  %v1309_v45 = vperm.slane %v1301_v29, %v3944_v36  ;;  %v4751_v19 = vperm.slane %v1399_v57, %v3944_v36  ;;  %v1422_v31 = vrot.slane %v1393_v54, 4 }
 0x1c4   :  { %3489 = vmatmul.msk.f32.vlgmr.msra.gmra.mxu3 %vm1686_vm1, %v697_v27  ;;  %v1264_v27 = vrot.slane %v3541_v63, 4  ;;  %v1434_v58 = vrot.slane %v1397_v61, 4  ;;  %v4754_v41 = vperm.slane %v1299_v17, %v3944_v36  ;;  %v4757_v0 = vperm.slane %v1401_v4, %v3944_v36 }
 0x1c5   :  { %v3552_v9 = vunpack.i.h.bf16 %v3550_v16  ;;  %v3551_v55 = vunpack.i.l.bf16 %v3550_v16  ;;  %v1336_v14 = vrot.slane %v4740_v38, 4  ;;  %v1340_v34 = vrot.slane %v4743_v56, 4 }
 0x1c6   :  { %v4762_v10 = vperm.slane %v1411_v26, %v3944_v36  ;;  %v1421_v43 = vperm.slane %v1413_v47, %v3944_v36  ;;  %v1348_v11 = vrot.slane %v1309_v45, 4  ;;  %v1448_v49 = vrot.slane %v4751_v19, 4 }
 0x1c7   :  { %v1374_v28 = vrot.slane %v3552_v9, 4  ;;  %v1262_v35 = vrot.slane %v3551_v55, 4  ;;  %v1265_v2 = vsel %vm254_vm0, %v3551_v55, %v1264_v27  ;;  %v1377_v15 = vsel %vm254_vm0, %v3552_v9, %v1376_v1 }
 0x1c8   :  { %v1273_v40 = vperm.slane %v1265_v2, %v3926_v12  ;;  %v1385_v42 = vperm.slane %v1377_v15, %v3926_v12  ;;  %v1344_v8 = vrot.slane %v4754_v41, 4  ;;  %v1452_v51 = vrot.slane %v4757_v0, 4 }
 0x1c9   :  { %v1263_v3 = vsel %vm254_vm0, %v1262_v35, %v3541_v63  ;;  %v1375_v39 = vsel %vm254_vm0, %v1374_v28, %v3542_v5  ;;  %v1456_v62 = vrot.slane %v4762_v10, 4  ;;  %v1460_v46 = vrot.slane %v1421_v43, 4 }
 0x1ca   :  { %v1269_v48 = vperm.slane %v1263_v3, %v3926_v12  ;;  %v1324_v33 = vrot.slane %v1273_v40, 4  ;;  %v1381_v25 = vperm.slane %v1375_v39, %v3926_v12  ;;  %v1436_v30 = vrot.slane %v1385_v42, 4 }
 0x1cb   :  { %v1323_v52 = vsel %vm254_vm0, %v1322_v50, %v1273_v40  ;;  %v1435_v59 = vsel %vm254_vm0, %v1434_v58, %v1385_v42 }
 0x1cc   :  { %v1312_v32 = vrot.slane %v1269_v48, 4  ;;  %v1424_v13 = vrot.slane %v1381_v25, 4  ;;  %v1311_v20 = vsel %vm254_vm0, %v1310_v37, %v1269_v48  ;;  %v1325_v63 = vsel %vm254_vm0, %v1285_v24, %v1324_v33 }
 0x1cd   :  { %v1317_v5 = vperm.slane %v1311_v20, %v3944_v36  ;;  %v1329_v6 = vperm.slane %v1323_v52, %v3944_v36  ;;  %v1333_v44 = vperm.slane %v1325_v63, %v3944_v36  ;;  %v1423_v23 = vsel %vm254_vm0, %v1422_v31, %v1381_v25 }
 0x1ce   :  { %v1313_v18 = vsel %vm254_vm0, %v1281_v22, %v1312_v32  ;;  %v1425_v60 = vsel %vm254_vm0, %v1393_v54, %v1424_v13  ;;  %v4788_v53 = vperm.slane %v1423_v23, %v3944_v36  ;;  %v1437_v7 = vsel %vm254_vm0, %v1397_v61, %v1436_v30 }
 0x1cf   :  { %v1321_v21 = vperm.slane %v1313_v18, %v3944_v36  ;;  %v1334_v24 = vrot.slane %v1317_v5, 4  ;;  %v1342_v1 = vrot.slane %v1329_v6, 4  ;;  %v1345_v27 = vsel %vm254_vm0, %v1329_v6, %v1344_v8 }
 0x1d0   :  { %v1346_v29 = vrot.slane %v1333_v44, 4  ;;  %v1349_v57 = vsel %vm254_vm0, %v1333_v44, %v1348_v11  ;;  %v4795_v17 = vperm.slane %v1425_v60, %v3944_v36  ;;  %v4798_v22 = vperm.slane %v1435_v59, %v3944_v36 }
 0x1d1   :  { %v1338_v54 = vrot.slane %v1321_v21, 4  ;;  %v1341_v4 = vsel %vm254_vm0, %v1321_v21, %v1340_v34  ;;  %v1445_v61 = vperm.slane %v1437_v7, %v3944_v36  ;;  %v1446_v26 = vrot.slane %v4788_v53, 4 }
 0x1d2   :  { %v1347_v47 = vsel %vm254_vm0, %v1346_v29, %v1309_v45  ;;  %v1450_v37 = vrot.slane %v4795_v17, 4  ;;  %v4807_v50 = vsel %vm254_vm0, %v4795_v17, %v1452_v51  ;;  %v1454_v16 = vrot.slane %v4798_v22, 4 }
 0x1d3   :  { %v4812_v31 = vsel %vm254_vm0, %v4798_v22, %v1456_v62  ;;  %v1458_v58 = vrot.slane %v1445_v61, 4  ;;  %v4815_v9 = vsel %vm254_vm0, %v1445_v61, %v1460_v46  ;;  %v1474_v55 = vrot.slane %v1341_v4, 4 }
 0x1d4   :  { %v1486_v34 = vrot.slane %v1347_v47, 4  ;;  %v1498_v28 = vrot.slane %v1349_v57, 4  ;;  %v1586_v45 = vrot.slane %v4807_v50, 4  ;;  %v1610_v35 = vrot.slane %v4815_v9, 4 }
 0x1d5   :  { %v4820_v2 = vsel %vm254_vm0, %v1458_v58, %v1421_v43  ;;  %v1612_v15 = vrot.slane %v4812_v31, 4  ;;  %v1335_v11 = vsel %vm254_vm0, %v1334_v24, %v4740_v38  ;;  %v1337_v40 = vsel %vm254_vm0, %v1317_v5, %v1336_v14 }
 0x1d6   :  { %v1598_v42 = vrot.slane %v4820_v2, 4  ;;  %v1339_v8 = vsel %vm254_vm0, %v1338_v54, %v4743_v56  ;;  %v1343_v51 = vsel %vm254_vm0, %v1342_v1, %v4754_v41  ;;  %v1475_v43 = vsel %vm254_vm0, %v1474_v55, %v1337_v40 }
 0x1d7   :  { %v1462_v3 = vrot.slane %v1339_v8, 4  ;;  %v1481_v39 = vperm.slane %v1475_v43, %v3926_v12  ;;  %v1487_v48 = vsel %vm254_vm0, %v1486_v34, %v1343_v51  ;;  %v1499_v33 = vsel %vm254_vm0, %v1498_v28, %v1345_v27 }
 0x1d8   :  { %v1493_v38 = vperm.slane %v1487_v48, %v3926_v12  ;;  %v1505_v14 = vperm.slane %v1499_v33, %v3926_v12  ;;  %v1464_v25 = vrot.slane %v1335_v11, 4  ;;  %v1476_v30 = vrot.slane %v1337_v40, 4 }
 0x1d9   :  { %v1463_v56 = vsel %vm254_vm0, %v1462_v3, %v1335_v11  ;;  %v1510_v62 = vrot.slane %v1481_v39, 4  ;;  %v1488_v46 = vrot.slane %v1343_v51, 4  ;;  %v1500_v41 = vrot.slane %v1345_v27, 4 }
 0x1da   :  { %v1469_v52 = vperm.slane %v1463_v56, %v3926_v12  ;;  %v1534_v59 = vrot.slane %v1505_v14, 4  ;;  %v1536_v32 = vrot.slane %v1493_v38, 4  ;;  %v1465_v13 = vsel %vm254_vm0, %v1339_v8, %v1464_v25 }
 0x1db   :  { %v1473_v20 = vperm.slane %v1465_v13, %v3926_v12  ;;  %v1477_v63 = vsel %vm254_vm0, %v1341_v4, %v1476_v30  ;;  %v1489_v5 = vsel %vm254_vm0, %v1347_v47, %v1488_v46  ;;  %v1501_v6 = vsel %vm254_vm0, %v1349_v57, %v1500_v41 }
 0x1dc   :  { %v1511_v44 = vsel %vm254_vm0, %v1510_v62, %v1469_v52  ;;  %v1535_v23 = vsel %vm254_vm0, %v1534_v59, %v1493_v38  ;;  %v1512_v18 = vrot.slane %v1469_v52, 4  ;;  %v1537_v60 = vsel %vm254_vm0, %v1505_v14, %v1536_v32 }
 0x1dd   :  { %v1517_v7 = vperm.slane %v1511_v44, %v3944_v36  ;;  %v1541_v21 = vperm.slane %v1535_v23, %v3944_v36  ;;  %v1545_v24 = vperm.slane %v1537_v60, %v3944_v36  ;;  %v1485_v1 = vperm.slane %v1477_v63, %v3926_v12 }
 0x1de   :  { %v1513_v27 = vsel %vm254_vm0, %v1481_v39, %v1512_v18  ;;  %v1497_v29 = vperm.slane %v1489_v5, %v3926_v12  ;;  %v1509_v57 = vperm.slane %v1501_v6, %v3926_v12  ;;  %v1524_v54 = vrot.slane %v1473_v20, 4 }
 0x1df   :  { %v1558_v4 = vrot.slane %v1541_v21, 4  ;;  %v1560_v61 = vrot.slane %v1517_v7, 4  ;;  %v1521_v47 = vperm.slane %v1513_v27, %v3944_v36  ;;  %v1562_v58 = vrot.slane %v1545_v24, 4 }
 0x1e0   :  { %v1522_v55 = vrot.slane %v1485_v1, 4  ;;  %v1546_v34 = vrot.slane %v1509_v57, 4  ;;  %v1548_v28 = vrot.slane %v1497_v29, 4  ;;  %v1525_v11 = vsel %vm254_vm0, %v1485_v1, %v1524_v54 }
 0x1e1   :  { %v1559_v40 = vsel %vm254_vm0, %v1558_v4, %v1517_v7  ;;  %v1561_v8 = vsel %vm254_vm0, %v1541_v21, %v1560_v61  ;;  %v1563_v51 = vsel %vm254_vm0, %v1562_v58, %v1521_v47  ;;  %v1564_v43 = vrot.slane %v1521_v47, 4 }
 0x1e2   :  { %2266 = vmatpush.msra.mxu1 %v1559_v40  ;;  %2289 = vmatpush.msrb.mxu3 %v1561_v8  ;;  %v1523_v3 = vsel %vm254_vm0, %v1522_v55, %v1473_v20  ;;  %v1547_v39 = vsel %vm254_vm0, %v1546_v34, %v1497_v29  ;;  %v1533_v48 = vperm.slane %v1525_v11, %v3944_v36 }
 0x1e3   :  { %2312 = vmatpush.msrb.mxu0 %v1563_v51  ;;  %v1529_v33 = vperm.slane %v1523_v3, %v3944_v36  ;;  %v1553_v38 = vperm.slane %v1547_v39, %v3944_v36  ;;  %v1565_v14 = vsel %vm254_vm0, %v1545_v24, %v1564_v43  ;;  %v1549_v25 = vsel %vm254_vm0, %v1509_v57, %v1548_v28 }
 0x1e4   :  { %2335 = vmatpush.msrb.mxu1 %v1565_v14  ;;  %v1557_v30 = vperm.slane %v1549_v25, %v3944_v36  ;;  %v1447_v56 = vsel %vm254_vm0, %v1446_v26, %v4751_v19  ;;  %v1449_v62 = vsel %vm254_vm0, %v4788_v53, %v1448_v49  ;;  %v1451_v46 = vsel %vm254_vm0, %v1450_v37, %v4757_v0 }
 0x1e5   :  { %v1566_v41 = vrot.slane %v1553_v38, 4  ;;  %v1568_v52 = vrot.slane %v1529_v33, 4  ;;  %v1455_v59 = vsel %vm254_vm0, %v1454_v16, %v4762_v10  ;;  %v1574_v32 = vrot.slane %v1451_v46, 4 }
 0x1e6   :  { %v1570_v13 = vrot.slane %v1557_v30, 4  ;;  %v1576_v26 = vrot.slane %v1447_v56, 4  ;;  %v1587_v19 = vsel %vm254_vm0, %v1586_v45, %v1449_v62  ;;  %v1599_v49 = vsel %vm254_vm0, %v1598_v42, %v1455_v59 }
 0x1e7   :  { %v1567_v0 = vsel %vm254_vm0, %v1566_v41, %v1529_v33  ;;  %v1569_v53 = vsel %vm254_vm0, %v1553_v38, %v1568_v52  ;;  %v1575_v17 = vsel %vm254_vm0, %v1574_v32, %v1447_v56  ;;  %v1593_v22 = vperm.slane %v1587_v19, %v3926_v12 }
 0x1e8   :  { %2358 = vmatpush.msrb.mxu2 %v1567_v0  ;;  %2381 = vmatpush.msra.mxu3 %v1569_v53  ;;  %v1571_v10 = vsel %vm254_vm0, %v1570_v13, %v1533_v48  ;;  %v1581_v37 = vperm.slane %v1575_v17, %v3926_v12  ;;  %v1600_v16 = vrot.slane %v1455_v59, 4  ;;  %v1605_v45 = vperm.slane %v1599_v49, %v3926_v12 }
 0x1e9   :  { %2404 = vmatpush.msra.mxu0 %v1571_v10  ;;  %v1611_v42 = vsel %vm254_vm0, %v1610_v35, %v4812_v31  ;;  %v1622_v20 = vrot.slane %v1593_v22, 4  ;;  %v1572_v5 = vrot.slane %v1533_v48, 4  ;;  %v1577_v6 = vsel %vm254_vm0, %v1451_v46, %v1576_v26 }
 0x1ea   :  { %v1617_v44 = vperm.slane %v1611_v42, %v3926_v12  ;;  %v1624_v18 = vrot.slane %v1581_v37, 4  ;;  %v1648_v60 = vrot.slane %v1605_v45, 4  ;;  %v1585_v35 = vperm.slane %v1577_v6, %v3926_v12 }
 0x1eb   :  { %v1623_v7 = vsel %vm254_vm0, %v1622_v20, %v1581_v37  ;;  %v4910_v21 = vsel %vm254_vm0, %v1557_v30, %v1572_v5  ;;  %v1588_v24 = vrot.slane %v1449_v62, 4  ;;  %v1601_v47 = vsel %vm254_vm0, %v4820_v2, %v1600_v16 }
 0x1ec   :  { %v1629_v1 = vperm.slane %v1623_v7, %v3944_v36  ;;  %v1646_v27 = vrot.slane %v1617_v44, 4  ;;  %v1625_v29 = vsel %vm254_vm0, %v1593_v22, %v1624_v18  ;;  %v1649_v57 = vsel %vm254_vm0, %v1617_v44, %v1648_v60 }
 0x1ed   :  { %v1633_v54 = vperm.slane %v1625_v29, %v3944_v36  ;;  %v1657_v4 = vperm.slane %v1649_v57, %v3944_v36  ;;  %v1589_v61 = vsel %vm254_vm0, %v4807_v50, %v1588_v24  ;;  %v1609_v28 = vperm.slane %v1601_v47, %v3926_v12 }
 0x1ee   :  { %v1647_v58 = vsel %vm254_vm0, %v1646_v27, %v1605_v45  ;;  %v1672_v55 = vrot.slane %v1629_v1, 4  ;;  %v1597_v34 = vperm.slane %v1589_v61, %v3926_v12  ;;  %v1613_v51 = vsel %vm254_vm0, %v4815_v9, %v1612_v15 }
 0x1ef   :  { %v1653_v11 = vperm.slane %v1647_v58, %v3944_v36  ;;  %v1674_v40 = vrot.slane %v1657_v4, 4  ;;  %v1676_v8 = vrot.slane %v1633_v54, 4  ;;  %v1636_v50 = vrot.slane %v1585_v35, 4 }
 0x1f0   :  { %v1660_v43 = vrot.slane %v1609_v28, 4  ;;  %v1621_v33 = vperm.slane %v1613_v51, %v3926_v12  ;;  %v1634_v15 = vrot.slane %v1597_v34, 4 }
 0x1f1   :  { %v1670_v3 = vrot.slane %v1653_v11, 4  ;;  %v4933_v39 = vsel %vm254_vm0, %v1653_v11, %v1672_v55  ;;  %v4936_v48 = vsel %vm254_vm0, %v1674_v40, %v1633_v54  ;;  %v4942_v31 = vsel %vm254_vm0, %v1657_v4, %v1676_v8 }
 0x1f2   :  { %v1637_v9 = vsel %vm254_vm0, %v1597_v34, %v1636_v50  ;;  %v1661_v30 = vsel %vm254_vm0, %v1621_v33, %v1660_v43  ;;  %v1658_v56 = vrot.slane %v1621_v33, 4  ;;  %v1635_v46 = vsel %vm254_vm0, %v1634_v15, %v1585_v35 }
 0x1f3   :  { %v1671_v14 = vsel %vm254_vm0, %v1670_v3, %v1629_v1  ;;  %v1645_v25 = vperm.slane %v1637_v9, %v3944_v36  ;;  %v1669_v62 = vperm.slane %v1661_v30, %v3944_v36  ;;  %v1641_v41 = vperm.slane %v1635_v46, %v3944_v36 }
 0x1f4   :  { %2450 = vmatpush.msra.mxu2 %v1671_v14  ;;  %v1659_v52 = vsel %vm254_vm0, %v1658_v56, %v1609_v28 }
 0x1f5   :  { %v1684_v59 = vrot.slane %v1645_v25, 4  ;;  %v1682_v32 = vrot.slane %v1669_v62, 4  ;;  %v1665_v13 = vperm.slane %v1659_v52, %v3944_v36  ;;  %v1680_v26 = vrot.slane %v1641_v41, 4 }
 0x1f7   :  { %v4954_v19 = vsel %vm254_vm0, %v1669_v62, %v1684_v59  ;;  %v4957_v49 = vsel %vm254_vm0, %v1682_v32, %v1645_v25  ;;  %v1678_v0 = vrot.slane %v1665_v13, 4  ;;  %v4960_v17 = vsel %vm254_vm0, %v1665_v13, %v1680_v26 }
 0x1f9   :  { %v4964_v10 = vsel %vm254_vm0, %v1678_v0, %v1641_v41 }
 0x1fe   :  { %v4902_v63 = vpop.f32.mrf.mxu3 }
 0x1ff   :  { %v2104_v23 = vsel %vm2103_vm2, %v4902_v63, -inf }
 0x200   :  { %2105 = vmax.xlane.f32.xlu2 %v2104_v23 }
 0x203   :  { %v4981_v18 = vpop.f32.mrf.mxu1 }
 0x204   :  { %v2125_v7 = vsel %vm2103_vm2, %v4981_v18, -inf }
 0x205   :  { %v1866_v37 = vpop.f32.mrf.mxu0 }
 0x206   :  { %v4930_v2 = vpop.f32.mrf.mxu3  ;;  %v2122_v16 = vsel %vm2103_vm2, %v1866_v37, -inf }
 0x207   :  { %v2107_v38 = vsel %vm2103_vm2, %v4930_v2, -inf }
 0x208   :  { %2108 = vmax.xlane.f32.xlu0 %v2107_v38 }
 0x20f   :  { %v1762_v53 = vpop.f32.mrf.mxu3 }
 0x210   :  { %v2110_v22 = vsel %vm2103_vm2, %v1762_v53, -inf }
 0x211   :  { %2111 = vmax.xlane.f32.xlu1 %v2110_v22 }
 0x219   :  { %2123 = vmax.xlane.f32.xlu1 %v2122_v16 }
 0x21f   :  { %v4967_v45 = vpop.f32.mrf.mxu3 }
 0x220   :  { %v2113_v42 = vsel %vm2103_vm2, %v4967_v45, -inf }
 0x221   :  { %2114 = vmax.xlane.f32.xlu2 %v2113_v42 }
 0x227   :  { %v4971_v20 = vpop.f32.mrf.mxu3 }
 0x228   :  { %v2116_v5 = vsel %vm2103_vm2, %v4971_v20, -inf }
 0x229   :  { %2117 = vmax.xlane.f32.xlu2 %v2116_v5  ;;  %v4999_v54 = vpop.f32.mrf.mxu1 }
 0x22a   :  { %v4979_v23 = vpop.f32.mrf.mxu0  ;;  %v2137_v55 = vsel %vm2103_vm2, %v4999_v54, -inf }
 0x22b   :  { %v2134_v29 = vsel %vm2103_vm2, %v4979_v23, -inf }
 0x22f   :  { %v4975_v6 = vpop.f32.mrf.mxu3 }
 0x230   :  { %v2119_v44 = vsel %vm2103_vm2, %v4975_v6, -inf }
 0x231   :  { %2120 = vmax.xlane.f32.xlu0 %v2119_v44  ;;  %v5011_v34 = vpop.f32.mrf.mxu1 }
 0x232   :  { %v4989_v24 = vpop.f32.mrf.mxu0  ;;  %v2149_v28 = vsel %vm2103_vm2, %v5011_v34, -inf }
 0x233   :  { %v2140_v27 = vsel %vm2103_vm2, %v4989_v24, -inf }
 0x237   :  { %v4983_v60 = vpop.f32.mrf.mxu3 }
 0x238   :  { %v2128_v35 = vsel %vm2103_vm2, %v4983_v60, -inf }
 0x239   :  { %2126 = vmax.xlane.f32.xlu0 %v2125_v7  ;;  %2129 = vmax.xlane.f32.xlu2 %v2128_v35 }
 0x23a   :  { %v5001_v4 = vpop.f32.mrf.mxu0 }
 0x23b   :  { %v2146_v47 = vsel %vm2103_vm2, %v5001_v4, -inf }
 0x23f   :  { %v4991_v1 = vpop.f32.mrf.mxu3 }
 0x240   :  { %v2131_v57 = vsel %vm2103_vm2, %v4991_v1, -inf }
 0x241   :  { %2141 = vmax.xlane.f32.xlu0 %v2140_v27  ;;  %2135 = vmax.xlane.f32.xlu2 %v2134_v29 }
 0x242   :  { %2132 = vmax.xlane.f32.xlu1 %v2131_v57 }
 0x247   :  { %v5003_v61 = vpop.f32.mrf.mxu3 }
 0x248   :  { %v2143_v58 = vsel %vm2103_vm2, %v5003_v61, -inf }
 0x249   :  { %2147 = vmax.xlane.f32.xlu0 %v2146_v47  ;;  %2144 = vmax.xlane.f32.xlu2 %v2143_v58 }
 0x24a   :  { %2138 = vmax.xlane.f32.xlu1 %v2137_v55 }
 0x252   :  { %2150 = vmax.xlane.f32.xlu1 %v2149_v28 }
 0x273   :  { %v2106_v11 = vpop.xlane.xlu2 %2105 }
 0x274   :  { %v2152_v40 = vsub.f32 %v4902_v63, %v2106_v11 }
 0x276   :  { %v2168_v8 = vmul.f32 1.442695, %v2152_v40 }
 0x278   :  { %3584 = vpow2.f32 %v2168_v8 }
 0x27b   :  { %v2109_v51 = vpop.xlane.xlu0 %2108 }
 0x27c   :  { %v2153_v50 = vsub.f32 %v4930_v2, %v2109_v51 }
 0x27e   :  { %v3585_v43 = vpop.eup %3584  ;;  %v2170_v3 = vmul.f32 1.442695, %v2153_v50 }
 0x27f   :  { %3494 = vmatmul.msk.f32.vlgmr.msra.gmra.mxu1 %vm2103_vm2, %v3585_v43  ;;  %v2200_v33 = vsel %vm2103_vm2, %v3585_v43, 0.0 }
 0x280   :  { %3586 = vpow2.f32 %v2170_v3  ;;  %2427 = vmatpush.msra.mxu1 %v4910_v21  ;;  %2201 = vadd.xlane.f32.xlu1 %v2200_v33 }
 0x284   :  { %v2112_v38 = vpop.xlane.xlu1 %2111 }
 0x285   :  { %v2154_v9 = vsub.f32 %v1762_v53, %v2112_v38 }
 0x286   :  { %v5020_v15 = vpop.eup %3586 }
 0x287   :  { %v2172_v63 = vmul.f32 1.442695, %v2154_v9  ;;  %3495 = vmatmul.msk.f32.vlgmr.msrb.gmra.mxu3 %vm2103_vm2, %v5020_v15 }
 0x288   :  { %2473 = vmatpush.msrb.mxu3 %v4933_v39 }
 0x289   :  { %3588 = vpow2.f32 %v2172_v63 }
 0x28c   :  { %v2124_v2 = vpop.xlane.xlu1 %2123 }
 0x28d   :  { %v2158_v14 = vsub.f32 %v1866_v37, %v2124_v2 }
 0x28f   :  { %v5025_v25 = vpop.eup %3588  ;;  %v2180_v30 = vmul.f32 1.442695, %v2158_v14  ;;  %v2203_v14 = vsel %vm2103_vm2, %v5020_v15, 0.0 }
 0x290   :  { %3496 = vmatmul.msk.f32.vlgmr.msrb.gmra.mxu0 %vm2103_vm2, %v5025_v25  ;;  %v2206_v63 = vsel %vm2103_vm2, %v5025_v25, 0.0 }
 0x291   :  { %3590 = vpow2.f32 %v2180_v30  ;;  %2496 = vmatpush.msrb.mxu0 %v4936_v48 }
 0x294   :  { %v2115_v21 = vpop.xlane.xlu2 %2114 }
 0x295   :  { %v2155_v56 = vsub.f32 %v4967_v45, %v2115_v21 }
 0x297   :  { %v3591_v62 = vpop.eup %3590  ;;  %v2174_v46 = vmul.f32 1.442695, %v2155_v56 }
 0x298   :  { %3500 = vmatmul.msk.f32.vlgmr.msra.gmra.mxu0 %vm2103_vm2, %v3591_v62  ;;  %v2218_v39 = vsel %vm2103_vm2, %v3591_v62, 0.0 }
 0x299   :  { %3592 = vpow2.f32 %v2174_v46  ;;  %2588 = vmatpush.msra.mxu0 %v4957_v49  ;;  %2219 = vadd.xlane.f32.xlu0 %v2218_v39 }
 0x29c   :  { %v2118_v41 = vpop.xlane.xlu2 %2117 }
 0x29d   :  { %v2156_v52 = vsub.f32 %v4971_v20, %v2118_v41 }
 0x29f   :  { %v5035_v59 = vpop.eup %3592  ;;  %v2176_v32 = vmul.f32 1.442695, %v2156_v52 }
 0x2a0   :  { %3497 = vmatmul.msk.f32.vlgmr.msrb.gmra.mxu1 %vm2103_vm2, %v5035_v59  ;;  %v2209_v30 = vsel %vm2103_vm2, %v5035_v59, 0.0 }
 0x2a1   :  { %3594 = vpow2.f32 %v2176_v32  ;;  %2519 = vmatpush.msrb.mxu1 %v4942_v31 }
 0x2a4   :  { %v2121_v48 = vpop.xlane.xlu0 %2120 }
 0x2a5   :  { %v2157_v13 = vsub.f32 %v4975_v6, %v2121_v48 }
 0x2a7   :  { %v3595_v26 = vpop.eup %3594  ;;  %v2178_v0 = vmul.f32 1.442695, %v2157_v13 }
 0x2a8   :  { %3498 = vmatmul.msk.f32.vlgmr.msrb.gmra.mxu2 %vm2103_vm2, %v3595_v26 }
 0x2a9   :  { %3596 = vpow2.f32 %v2178_v0  ;;  %2542 = vmatpush.msrb.mxu2 %v4964_v10 }
 0x2ac   :  { %v2127_v49 = vpop.xlane.xlu0 %2126  ;;  %v2130_v53 = vpop.xlane.xlu2 %2129 }
 0x2ad   :  { %v2159_v22 = vsub.f32 %v4981_v18, %v2127_v49  ;;  %v2160_v37 = vsub.f32 %v4983_v60, %v2130_v53 }
 0x2af   :  { %v5045_v16 = vpop.eup %3596  ;;  %v2182_v45 = vmul.f32 1.442695, %v2159_v22  ;;  %v2184_v31 = vmul.f32 1.442695, %v2160_v37 }
 0x2b0   :  { %3499 = vmatmul.msk.f32.vlgmr.msra.gmra.mxu3 %vm2103_vm2, %v5045_v16  ;;  %v2215_v21 = vsel %vm2103_vm2, %v5045_v16, 0.0 }
 0x2b1   :  { %3598 = vpow2.f32 %v2182_v45  ;;  %2565 = vmatpush.msra.mxu3 %v4960_v17 }
 0x2b2   :  { %3600 = vpow2.f32 %v2184_v31 }
 0x2b4   :  { %v2142_v42 = vpop.xlane.xlu0 %2141  ;;  %v2136_v20 = vpop.xlane.xlu2 %2135 }
 0x2b5   :  { %v2164_v10 = vsub.f32 %v4989_v24, %v2142_v42  ;;  %v2162_v5 = vsub.f32 %v4979_v23, %v2136_v20  ;;  %v2133_v6 = vpop.xlane.xlu1 %2132 }
 0x2b6   :  { %v2161_v44 = vsub.f32 %v4991_v1, %v2133_v6 }
 0x2b7   :  { %v3599_v18 = vpop.eup %3598  ;;  %v2192_v60 = vmul.f32 1.442695, %v2164_v10  ;;  %v2188_v7 = vmul.f32 1.442695, %v2162_v5 }
 0x2b8   :  { %v3601_v35 = vpop.eup %3600  ;;  %v2186_v27 = vmul.f32 1.442695, %v2161_v44  ;;  %3501 = vmatmul.msk.f32.vlgmr.msra.gmra.mxu1 %vm2103_vm2, %v3599_v18  ;;  %v2221_v29 = vsel %vm2103_vm2, %v3599_v18, 0.0 }
 0x2b9   :  { %3602 = vpow2.f32 %v2192_v60  ;;  %3502 = vmatmul.msk.f32.vlgmr.msra.gmra.mxu2 %vm2103_vm2, %v3601_v35  ;;  %2611 = vmatpush.msra.mxu1 %v4954_v19  ;;  %v2224_v38 = vsel %vm2103_vm2, %v3601_v35, 0.0 }
 0x2ba   :  { %3604 = vpow2.f32 %v2188_v7  ;;  %2222 = vadd.xlane.f32.xlu0 %v2221_v29 }
 0x2bb   :  { %3606 = vpow2.f32 %v2186_v27 }
 0x2bc   :  { %v2148_v17 = vpop.xlane.xlu0 %2147  ;;  %v2145_v23 = vpop.xlane.xlu2 %2144 }
 0x2bd   :  { %v2166_v24 = vsub.f32 %v5001_v4, %v2148_v17  ;;  %v2139_v1 = vpop.xlane.xlu1 %2138  ;;  %v2165_v57 = vsub.f32 %v5003_v61, %v2145_v23  ;;  %v2212_v4 = vsel %vm2103_vm2, %v3595_v26, 0.0 }
 0x2be   :  { %v2163_v47 = vsub.f32 %v4999_v54, %v2139_v1 }
 0x2bf   :  { %v3603_v58 = vpop.eup %3602  ;;  %v2196_v55 = vmul.f32 1.442695, %v2166_v24  ;;  %v2194_v28 = vmul.f32 1.442695, %v2165_v57 }
 0x2c0   :  { %v3605_v11 = vpop.eup %3604  ;;  %v2190_v40 = vmul.f32 1.442695, %v2163_v47  ;;  %v2236_v8 = vsel %vm2103_vm2, %v3603_v58, 0.0 }
 0x2c1   :  { %v3607_v19 = vpop.eup %3606  ;;  %3608 = vpow2.f32 %v2196_v55  ;;  %3504 = vmatmul.msk.f32.vlgmr.msrb.gmra.mxu0 %vm2103_vm2, %v3605_v11  ;;  %3506 = vmatmul.msk.f32.vlgmr.msrb.gmra.mxu2 %vm2103_vm2, %v3603_v58  ;;  %v2230_v51 = vsel %vm2103_vm2, %v3605_v11, 0.0 }
 0x2c2   :  { %3610 = vpow2.f32 %v2190_v40  ;;  %3503 = vmatmul.msk.f32.vlgmr.msrb.gmra.mxu3 %vm2103_vm2, %v3607_v19  ;;  %2213 = vadd.xlane.f32.xlu0 %v2212_v4  ;;  %v2227_v2 = vsel %vm2103_vm2, %v3607_v19, 0.0 }
 0x2c3   :  { %3612 = vpow2.f32 %v2194_v28  ;;  %2231 = vadd.xlane.f32.xlu1 %v2230_v51  ;;  %2237 = vadd.xlane.f32.xlu2 %v2236_v8 }
 0x2c5   :  { %v2151_v54 = vpop.xlane.xlu1 %2150 }
 0x2c6   :  { %v2167_v61 = vsub.f32 %v5011_v34, %v2151_v54 }
 0x2c7   :  { %v3609_v50 = vpop.eup %3608 }
 0x2c8   :  { %v3611_v43 = vpop.eup %3610  ;;  %v2198_v3 = vmul.f32 1.442695, %v2167_v61  ;;  %v2242_v56 = vsel %vm2103_vm2, %v3609_v50, 0.0 }
 0x2c9   :  { %v3613_v33 = vpop.eup %3612  ;;  %3505 = vmatmul.msk.f32.vlgmr.msrb.gmra.mxu1 %vm2103_vm2, %v3611_v43  ;;  %3508 = vmatmul.msk.f32.vlgmr.msra.gmra.mxu0 %vm2103_vm2, %v3609_v50  ;;  %v2233_v9 = vsel %vm2103_vm2, %v3611_v43, 0.0 }
 0x2ca   :  { %3614 = vpow2.f32 %v2198_v3  ;;  %3507 = vmatmul.msk.f32.vlgmr.msra.gmra.mxu3 %vm2103_vm2, %v3613_v33  ;;  %2225 = vadd.xlane.f32.xlu0 %v2224_v38  ;;  %v2239_v25 = vsel %vm2103_vm2, %v3613_v33, 0.0 }
 0x2cb   :  { %2234 = vadd.xlane.f32.xlu1 %v2233_v9  ;;  %2207 = vadd.xlane.f32.xlu2 %v2206_v63 }
 0x2d0   :  { %v3615_v34 = vpop.eup %3614 }
 0x2d1   :  { %3509 = vmatmul.msk.f32.vlgmr.msra.gmra.mxu1 %vm2103_vm2, %v3615_v34  ;;  %v2245_v62 = vsel %vm2103_vm2, %v3615_v34, 0.0 }
 0x2d2   :  { %2228 = vadd.xlane.f32.xlu0 %v2227_v2 }
 0x2d3   :  { %2204 = vadd.xlane.f32.xlu1 %v2203_v14  ;;  %2210 = vadd.xlane.f32.xlu2 %v2209_v30 }
 0x2db   :  { %2216 = vadd.xlane.f32.xlu2 %v2215_v21  ;;  %2240 = vadd.xlane.f32.xlu1 %v2239_v25 }
 0x2e3   :  { %2243 = vadd.xlane.f32.xlu2 %v2242_v56 }
 0x2eb   :  { %2246 = vadd.xlane.f32.xlu2 %v2245_v62 }
 0x2f3   :  { %v2202_v46 = vpop.xlane.xlu1 %2201 }
 0x2f4   :  { %3616 = vrcp.f32 %v2202_v46  ;;  %vm2621_vm5 = vweird.f32 %v2202_v46  ;;  %v2627_v53 = vand.u32 2147483648, %v2202_v46  ;;  %v2625_v37 = vand.u32 2147483647, %v2202_v46 }
 0x2f6   :  { %v2628_v10 = vor.u32 1.1754944e-38, %v2627_v53  ;;  %vm2626_vm9 = vcmp.eq.f32.partialorder %v2625_v37, 8.507059e+37 }
 0x2fa   :  { %v3617_v39 = vpop.eup %3616 }
 0x2fb   :  { %v2617_v52 = vmul.f32 %v3617_v39, %v2202_v46  ;;  %vm2622_vm3 = vweird.f32 %v3617_v39 }
 0x2fc   :  { %vm2623_vm6 = vmor %vm2621_vm5, %vm2622_vm3  ;;  %v2268_v35 = vpop.f32.mrf.mxu1 }
 0x2fd   :  { %v2618_v32 = vsub.f32 1.0, %v2617_v52 }
 0x2ff   :  { %v2619_v13 = vmul.f32 %v3617_v39, %v2618_v32 }
 0x301   :  { %v2620_v0 = vadd.f32 %v3617_v39, %v2619_v13 }
 0x303   :  { %v2624_v31 = vsel %vm2623_vm6, %v3617_v39, %v2620_v0 }
 0x304   :  { %v2629_v6 = vsel %vm2626_vm9, %v2628_v10, %v2624_v31 }
 0x305   :  { %v2630_v18 = vmul.f32 0.25, %v2629_v6 }
 0x307   :  { %v5091_v1 = vmul.f32 %v2630_v18, %v2268_v35 }
 0x309   :  { %v2874_v11 = vrot.slane %v5091_v1, 4 }
 0x30c   :  { %v2220_v15 = vpop.xlane.xlu0 %2219 }
 0x30d   :  { %3618 = vrcp.f32 %v2220_v15  ;;  %v2717_v22 = vand.u32 2147483648, %v2220_v15  ;;  %v5085_v16 = vpop.f32.mrf.mxu0  ;;  %vm2711_vm7 = vweird.f32 %v2220_v15  ;;  %v2715_v45 = vand.u32 2147483647, %v2220_v15 }
 0x30f   :  { %v2718_v5 = vor.u32 1.1754944e-38, %v2717_v22  ;;  %vm2716_vm10 = vcmp.eq.f32.partialorder %v2715_v45, 8.507059e+37 }
 0x313   :  { %v3619_v41 = vpop.eup %3618 }
 0x314   :  { %v2707_v59 = vmul.f32 %v3619_v41, %v2220_v15  ;;  %vm2712_vm4 = vweird.f32 %v3619_v41 }
 0x315   :  { %vm2713_vm8 = vmor %vm2711_vm7, %vm2712_vm4  ;;  %v2406_v27 = vpop.f32.mrf.mxu0 }
 0x316   :  { %v2708_v48 = vsub.f32 1.0, %v2707_v59 }
 0x318   :  { %v2709_v26 = vmul.f32 %v3619_v41, %v2708_v48 }
 0x31a   :  { %v2710_v49 = vadd.f32 %v3619_v41, %v2709_v26 }
 0x31c   :  { %v2714_v42 = vsel %vm2713_vm8, %v3619_v41, %v2710_v49 }
 0x31d   :  { %v2719_v44 = vsel %vm2716_vm10, %v2718_v5, %v2714_v42  ;;  %v5099_v4 = vpop.f32.mrf.mxu1 }
 0x31e   :  { %v2720_v60 = vmul.f32 0.25, %v2719_v44 }
 0x320   :  { %v5093_v57 = vmul.f32 %v2720_v60, %v2406_v27 }
 0x322   :  { %v2896_v40 = vrot.slane %v5093_v57, 4 }
 0x32b   :  { %v2360_v53 = vpop.f32.mrf.mxu2 }
 0x32d   :  { %v2223_v20 = vpop.xlane.xlu0 %2222 }
 0x32e   :  { %3620 = vrcp.f32 %v2223_v20  ;;  %v2730_v58 = vand.u32 2147483647, %v2223_v20  ;;  %v2732_v55 = vand.u32 2147483648, %v2223_v20  ;;  %vm2726_vm12 = vweird.f32 %v2223_v20 }
 0x330   :  { %vm2731_vm14 = vcmp.eq.f32.partialorder %v2730_v58, 8.507059e+37  ;;  %v2733_v61 = vor.u32 1.1754944e-38, %v2732_v55 }
 0x334   :  { %v3621_v7 = vpop.eup %3620 }
 0x335   :  { %v2722_v29 = vmul.f32 %v3621_v7, %v2223_v20  ;;  %v2214_v17 = vpop.xlane.xlu0 %2213  ;;  %vm2727_vm11 = vweird.f32 %v3621_v7  ;;  %v2429_v37 = vpop.f32.mrf.mxu1 }
 0x336   :  { %3622 = vrcp.f32 %v2214_v17  ;;  %v5087_v23 = vpop.xlane.xlu1 %2231  ;;  %v5089_v24 = vpop.xlane.xlu2 %2237  ;;  %v2685_v51 = vand.u32 2147483647, %v2214_v17  ;;  %v2687_v54 = vand.u32 2147483648, %v2214_v17  ;;  %vm2728_vm13 = vmor %vm2726_vm12, %vm2727_vm11  ;;  %vm2681_vm15 = vweird.f32 %v2214_v17 }
 0x337   :  { %v2723_v47 = vsub.f32 1.0, %v2722_v29  ;;  %3624 = vrcp.f32 %v5087_v23  ;;  %vm2771_vm2 = vweird.f32 %v5087_v23  ;;  %v2775_v2 = vand.u32 2147483647, %v5087_v23 }
 0x338   :  { %3626 = vrcp.f32 %v5089_v24  ;;  %v2777_v25 = vand.u32 2147483648, %v5087_v23  ;;  %v2807_v56 = vand.u32 2147483648, %v5089_v24  ;;  %vm5117_vm4 = vcmp.eq.f32.partialorder %v2685_v51, 8.507059e+37 }
 0x339   :  { %v2724_v28 = vmul.f32 %v3621_v7, %v2723_v47  ;;  %v2688_v46 = vor.u32 1.1754944e-38, %v2687_v54  ;;  %vm5123_vm5 = vcmp.eq.f32.partialorder %v2775_v2, 8.507059e+37  ;;  %v2805_v48 = vand.u32 2147483647, %v5089_v24 }
 0x33a   :  { %v2778_v26 = vor.u32 1.1754944e-38, %v2777_v25  ;;  %vm2801_vm6 = vweird.f32 %v5089_v24  ;;  %v5129_v0 = vor.u32 1.1754944e-38, %v2807_v56 }
 0x33b   :  { %v2725_v8 = vadd.f32 %v3621_v7, %v2724_v28  ;;  %vm5146_vm10 = vcmp.eq.f32.partialorder %v2805_v48, 8.507059e+37 }
 0x33c   :  { %v3623_v19 = vpop.eup %3622 }
 0x33d   :  { %v3625_v50 = vpop.eup %3624  ;;  %v2677_v43 = vmul.f32 %v3623_v19, %v2214_v17  ;;  %v2729_v3 = vsel %vm2728_vm13, %v3621_v7, %v2725_v8  ;;  %v5101_v33 = vpop.xlane.xlu0 %2225  ;;  %vm2682_vm3 = vweird.f32 %v3623_v19 }
 0x33e   :  { %v5104_v38 = vpop.eup %3626  ;;  %v2767_v9 = vmul.f32 %v3625_v50, %v5087_v23  ;;  %v2734_v63 = vsel %vm2731_vm14, %v2733_v61, %v2729_v3  ;;  %3628 = vrcp.f32 %v5101_v33  ;;  %v5108_v34 = vpop.xlane.xlu1 %2234  ;;  %vm2683_vm7 = vmor %vm2681_vm15, %vm2682_vm3  ;;  %v2745_v45 = vand.u32 2147483647, %v5101_v33 }
 0x33f   :  { %v2678_v14 = vsub.f32 1.0, %v2677_v43  ;;  %v2797_v30 = vmul.f32 %v5104_v38, %v5089_v24  ;;  %v5113_v21 = vpop.xlane.xlu2 %2207  ;;  %v2735_v52 = vmul.f32 0.25, %v2734_v63  ;;  %3630 = vrcp.f32 %v5108_v34  ;;  %v2498_v56 = vpop.f32.mrf.mxu0 }
 0x340   :  { %v2768_v15 = vsub.f32 1.0, %v2767_v9  ;;  %3632 = vrcp.f32 %v5113_v21  ;;  %vm2772_vm8 = vweird.f32 %v3625_v50  ;;  %v2747_v5 = vand.u32 2147483648, %v5101_v33 }
 0x341   :  { %v2679_v39 = vmul.f32 %v3623_v19, %v2678_v14  ;;  %v2798_v41 = vsub.f32 1.0, %v2797_v30  ;;  %v5135_v20 = vmul.f32 %v2735_v52, %v2429_v37  ;;  %vm2773_vm9 = vmor %vm2771_vm2, %vm2772_vm8  ;;  %v2655_v18 = vand.u32 2147483647, %v5113_v21  ;;  %v2452_v30 = vpop.f32.mrf.mxu2 }
 0x342   :  { %v2769_v59 = vmul.f32 %v3625_v50, %v2768_v15  ;;  %v2657_v17 = vand.u32 2147483648, %v5113_v21  ;;  %vm2741_vm11 = vweird.f32 %v5101_v33  ;;  %vm2802_vm13 = vweird.f32 %v5104_v38 }
 0x343   :  { %v2680_v13 = vadd.f32 %v3623_v19, %v2679_v39  ;;  %v2799_v22 = vmul.f32 %v5104_v38, %v2798_v41  ;;  %v2908_v51 = vrot.slane %v5135_v20, 4  ;;  %vm5161_vm14 = vcmp.eq.f32.partialorder %v2745_v45, 8.507059e+37  ;;  %vm5176_vm3 = vmor %vm2801_vm6, %vm2802_vm13 }
 0x344   :  { %v3629_v49 = vpop.eup %3628  ;;  %v2770_v31 = vadd.f32 %v3625_v50, %v2769_v59  ;;  %v2748_v61 = vor.u32 1.1754944e-38, %v2747_v5  ;;  %vm2651_vm15 = vweird.f32 %v5113_v21  ;;  %vm5170_vm2 = vcmp.eq.f32.partialorder %v2655_v18, 8.507059e+37 }
 0x345   :  { %v2684_v42 = vsel %vm2683_vm7, %v3623_v19, %v2680_v13  ;;  %v2737_v10 = vmul.f32 %v3629_v49, %v5101_v33  ;;  %v5141_v6 = vpop.xlane.xlu0 %2228  ;;  %v5151_v35 = vpop.eup %3630  ;;  %vm2742_vm12 = vweird.f32 %v3629_v49  ;;  %v2800_v58 = vadd.f32 %v5104_v38, %v2799_v22 }
 0x346   :  { %v2689_v44 = vsel %vm5117_vm4, %v2688_v46, %v2684_v42  ;;  %v2774_v60 = vsel %vm2773_vm9, %v3625_v50, %v2770_v31  ;;  %3634 = vrcp.f32 %v5141_v6  ;;  %v3633_v47 = vpop.eup %3632  ;;  %v5166_v50 = vpop.f32.mrf.mxu3  ;;  %v2782_v3 = vmul.f32 %v5151_v35, %v5108_v34  ;;  %vm2743_vm4 = vmor %vm2741_vm11, %vm2742_vm12 }
 0x347   :  { %v2690_v27 = vmul.f32 0.25, %v2689_v44  ;;  %v2738_v29 = vsub.f32 1.0, %v2737_v10  ;;  %v2779_v23 = vsel %vm5123_vm5, %v2778_v26, %v2774_v60  ;;  %v2647_v8 = vmul.f32 %v3633_v47, %v5113_v21  ;;  %v5192_v33 = vpop.xlane.xlu1 %2204  ;;  %v5200_v26 = vpop.xlane.xlu2 %2210 }
 0x348   :  { %v2780_v19 = vmul.f32 0.25, %v2779_v23  ;;  %v2658_v63 = vor.u32 1.1754944e-38, %v2657_v17  ;;  %v2804_v62 = vsel %vm5176_vm3, %v5104_v38, %v2800_v58  ;;  %vm2756_vm5 = vweird.f32 %v5141_v6 }
 0x349   :  { %v2860_v55 = vmul.f32 %v2690_v27, %v2360_v53  ;;  %v2739_v28 = vmul.f32 %v3629_v49, %v2738_v29  ;;  %v2648_v25 = vsub.f32 1.0, %v2647_v8  ;;  %v2760_v24 = vand.u32 2147483647, %v5141_v6 }
 0x34a   :  { %v2866_v39 = vmul.f32 %v2780_v19, %v2498_v56  ;;  %vm2652_vm6 = vweird.f32 %v3633_v47  ;;  %v2809_v48 = vsel %vm5146_vm10, %v5129_v0, %v2804_v62  ;;  %v2783_v53 = vsub.f32 1.0, %v2782_v3 }
 0x34b   :  { %v2740_v43 = vadd.f32 %v3629_v49, %v2739_v28  ;;  %v2897_v46 = vsel %vm254_vm0, %v2896_v40, %v2860_v55  ;;  %v2898_v52 = vrot.slane %v2860_v55, 4  ;;  %v2649_v32 = vmul.f32 %v3633_v47, %v2648_v25  ;;  %vm2653_vm7 = vmor %vm2651_vm15, %vm2652_vm6 }
 0x34c   :  { %v3635_v14 = vpop.eup %3634  ;;  %v2762_v40 = vand.u32 2147483648, %v5141_v6  ;;  %3636 = vrcp.f32 %v5192_v33  ;;  %v2984_v45 = vrot.slane %v2866_v39, 4  ;;  %v2810_v10 = vmul.f32 0.25, %v2809_v48 }
 0x34d   :  { %v2744_v15 = vsel %vm2743_vm4, %v3629_v49, %v2740_v43  ;;  %v2752_v41 = vmul.f32 %v3635_v14, %v5141_v6  ;;  %v5203_v49 = vperm.slane %v2897_v46, %v3926_v12  ;;  %v2650_v22 = vadd.f32 %v3633_v47, %v2649_v32  ;;  %v2544_v6 = vpop.f32.mrf.mxu2 }
 0x34e   :  { %v2749_v59 = vsel %vm5161_vm14, %v2748_v61, %v2744_v15  ;;  %vm2757_vm8 = vweird.f32 %v3635_v14  ;;  %v2899_v0 = vsel %vm254_vm0, %v5093_v57, %v2898_v52  ;;  %3638 = vrcp.f32 %v5200_v26  ;;  %v5213_v7 = vpop.f32.mrf.mxu3 }
 0x34f   :  { %v2750_v38 = vmul.f32 0.25, %v2749_v59  ;;  %v2753_v13 = vsub.f32 1.0, %v2752_v41  ;;  %v2654_v42 = vsel %vm2653_vm7, %v3633_v47, %v2650_v22  ;;  %v2763_v60 = vor.u32 1.1754944e-38, %v2762_v40  ;;  %vm2758_vm9 = vmor %vm2756_vm5, %vm2757_vm8  ;;  %v5244_v56 = vpop.xlane.xlu2 %2216  ;;  %v5250_v15 = vpop.xlane.xlu1 %2240 }
 0x350   :  { %v2659_v5 = vsel %vm5170_vm2, %v2658_v63, %v2654_v42  ;;  %v2640_v57 = vand.u32 2147483647, %v5192_v33  ;;  %v2642_v29 = vand.u32 2147483648, %v5192_v33  ;;  %v5221_v17 = vperm.slane %v2899_v0, %v3926_v12 }
 0x351   :  { %v2864_v37 = vmul.f32 %v2750_v38, %v2452_v30  ;;  %v2754_v31 = vmul.f32 %v3635_v14, %v2753_v13  ;;  %v2660_v21 = vmul.f32 0.25, %v2659_v5  ;;  %v2784_v23 = vmul.f32 %v5151_v35, %v2783_v53 }
 0x352   :  { %vm2761_vm10 = vcmp.eq.f32.partialorder %v2760_v24, 8.507059e+37  ;;  %v3637_v58 = vpop.eup %3636  ;;  %v2946_v55 = vrot.slane %v5203_v49, 4  ;;  %v5230_v61 = vmul.f32 %v2810_v10, %v2544_v6  ;;  %vm2636_vm11 = vweird.f32 %v5192_v33 }
 0x353   :  { %v2986_v44 = vrot.slane %v2864_v37, 4  ;;  %v2755_v18 = vadd.f32 %v3635_v14, %v2754_v31  ;;  %v2985_v27 = vsel %vm254_vm0, %v2984_v45, %v2864_v37  ;;  %v2858_v28 = vmul.f32 %v2660_v21, %v5085_v16 }
 0x354   :  { %v5228_v54 = vperm.slane %v2985_v27, %v3926_v12  ;;  %v2632_v43 = vmul.f32 %v3637_v58, %v5192_v33  ;;  %v3639_v3 = vpop.eup %3638  ;;  %vm5234_vm12 = vcmp.eq.f32.partialorder %v2640_v57, 8.507059e+37  ;;  %v2643_v63 = vor.u32 1.1754944e-38, %v2642_v29  ;;  %v2521_v57 = vpop.f32.mrf.mxu1 }
 0x355   :  { %v2759_v47 = vsel %vm2758_vm9, %v3635_v14, %v2755_v18  ;;  %v2987_v8 = vsel %vm254_vm0, %v2866_v39, %v2986_v44  ;;  %vm2666_vm13 = vweird.f32 %v5200_v26  ;;  %v2670_v16 = vand.u32 2147483647, %v5200_v26 }
 0x356   :  { %v2764_v19 = vsel %vm2761_vm10, %v2763_v60, %v2759_v47  ;;  %v5241_v2 = vperm.slane %v2987_v8, %v3926_v12  ;;  %v2633_v30 = vsub.f32 1.0, %v2632_v43  ;;  %v2662_v25 = vmul.f32 %v3639_v3, %v5200_v26  ;;  %v2475_v59 = vpop.f32.mrf.mxu3 }
 0x357   :  { %v2765_v14 = vmul.f32 0.25, %v2764_v19  ;;  %v2872_v62 = vrot.slane %v2858_v28, 4  ;;  %v2875_v24 = vsel %vm254_vm0, %v2858_v28, %v2874_v11  ;;  %vm2637_vm14 = vweird.f32 %v3637_v58  ;;  %v5292_v28 = vpop.xlane.xlu2 %2243 }
 0x358   :  { %v2785_v46 = vadd.f32 %v5151_v35, %v2784_v23  ;;  %v2634_v39 = vmul.f32 %v3637_v58, %v2633_v30  ;;  %v2663_v41 = vsub.f32 1.0, %v2662_v25  ;;  %vm2667_vm15 = vweird.f32 %v3639_v3  ;;  %vm2638_vm5 = vmor %vm2636_vm11, %vm2637_vm14 }
 0x359   :  { %v2672_v52 = vand.u32 2147483648, %v5200_v26  ;;  %vm2786_vm2 = vweird.f32 %v5108_v34  ;;  %vm2787_vm3 = vweird.f32 %v5151_v35  ;;  %v2790_v32 = vand.u32 2147483647, %v5108_v34  ;;  %vm2668_vm8 = vmor %vm2666_vm13, %vm2667_vm15 }
 0x35a   :  { %v2792_v38 = vand.u32 2147483648, %v5108_v34  ;;  %v2635_v11 = vadd.f32 %v3637_v58, %v2634_v39  ;;  %v2664_v48 = vmul.f32 %v3639_v3, %v2663_v41  ;;  %vm5257_vm4 = vmor %vm2786_vm2, %vm2787_vm3  ;;  %v2865_v40 = vmul.f32 %v2765_v14, %v2475_v59 }
 0x35b   :  { %3640 = vrcp.f32 %v5250_v15  ;;  %v5263_v53 = vperm.slane %v2875_v24, %v3926_v12  ;;  %vm5268_vm6 = vcmp.eq.f32.partialorder %v2670_v16, 8.507059e+37  ;;  %v2789_v34 = vsel %vm5257_vm4, %v5151_v35, %v2785_v46 }
 0x35c   :  { %v2793_v37 = vor.u32 1.1754944e-38, %v2792_v38  ;;  %v2873_v45 = vsel %vm254_vm0, %v2872_v62, %v5091_v1  ;;  %v2639_v31 = vsel %vm2638_vm5, %v3637_v58, %v2635_v11  ;;  %v2665_v0 = vadd.f32 %v3639_v3, %v2664_v48 }
 0x35d   :  { %vm2791_vm7 = vcmp.eq.f32.partialorder %v2790_v32, 8.507059e+37  ;;  %v2644_v42 = vsel %vm5234_vm12, %v2643_v63, %v2639_v31  ;;  %v2673_v33 = vor.u32 1.1754944e-38, %v2672_v52  ;;  %3642 = vrcp.f32 %v5244_v56 }
 0x35e   :  { %v2794_v10 = vsel %vm2791_vm7, %v2793_v37, %v2789_v34  ;;  %v2645_v5 = vmul.f32 0.25, %v2644_v42  ;;  %v2669_v35 = vsel %vm2668_vm8, %v3639_v3, %v2665_v0  ;;  %v2998_v18 = vrot.slane %v2865_v40, 4 }
 0x35f   :  { %v2795_v44 = vmul.f32 0.25, %v2794_v10  ;;  %v2958_v1 = vrot.slane %v5221_v17, 4  ;;  %v3034_v60 = vrot.slane %v5228_v54, 4  ;;  %v3010_v21 = vrot.slane %v5230_v61, 4 }
 0x360   :  { %v2674_v27 = vsel %vm5268_vm6, %v2673_v33, %v2669_v35  ;;  %v3046_v29 = vrot.slane %v5241_v2, 4  ;;  %v2857_v23 = vmul.f32 %v2645_v5, %v5166_v50  ;;  %v5295_v8 = vperm.slane %v2873_v45, %v3926_v12 }
 0x361   :  { %v5288_v26 = vpop.eup %3640  ;;  %v2675_v47 = vmul.f32 0.25, %v2674_v27  ;;  %v2867_v58 = vmul.f32 %v2795_v44, %v2521_v57  ;;  %v2934_v6 = vrot.slane %v5263_v53, 4  ;;  %v2820_v43 = vand.u32 2147483647, %v5250_v15 }
 0x362   :  { %v2812_v19 = vmul.f32 %v5288_v26, %v5250_v15  ;;  %v2886_v3 = vrot.slane %v2857_v23, 4  ;;  %v2822_v25 = vand.u32 2147483648, %v5250_v15  ;;  %3644 = vrcp.f32 %v5292_v28 }
 0x363   :  { %v2859_v9 = vmul.f32 %v2675_v47, %v5099_v4  ;;  %v2996_v63 = vrot.slane %v2867_v58, 4  ;;  %v2999_v50 = vsel %vm254_vm0, %v2867_v58, %v2998_v18  ;;  %v3643_v16 = vpop.eup %3642  ;;  %v2922_v4 = vrot.slane %v5295_v8, 4  ;;  %v5346_v58 = vpop.xlane.xlu2 %2246 }
 0x364   :  { %v3007_v14 = vperm.slane %v2999_v50, %v3926_v12  ;;  %v2813_v30 = vsub.f32 1.0, %v2812_v19  ;;  %v2692_v39 = vmul.f32 %v3643_v16, %v5244_v56  ;;  %v2700_v59 = vand.u32 2147483647, %v5244_v56 }
 0x365   :  { %v2884_v62 = vrot.slane %v2859_v9, 4  ;;  %v2887_v24 = vsel %vm254_vm0, %v2859_v9, %v2886_v3  ;;  %v2997_v46 = vsel %vm254_vm0, %v2996_v63, %v2865_v40  ;;  %v2702_v48 = vand.u32 2147483648, %v5244_v56 }
 0x366   :  { %v2895_v41 = vperm.slane %v2887_v24, %v3926_v12  ;;  %v3003_v52 = vperm.slane %v2997_v46, %v3926_v12  ;;  %v3044_v38 = vrot.slane %v3007_v14, 4  ;;  %v3047_v11 = vsel %vm254_vm0, %v3007_v14, %v3046_v29 }
 0x367   :  { %v2885_v32 = vsel %vm254_vm0, %v2884_v62, %v2857_v23  ;;  %v2814_v22 = vmul.f32 %v5288_v26, %v2813_v30  ;;  %v2693_v34 = vsub.f32 1.0, %v2692_v39  ;;  %vm2816_vm9 = vweird.f32 %v5250_v15 }
 0x368   :  { %v2935_v13 = vsel %vm254_vm0, %v2895_v41, %v2934_v6  ;;  %v3032_v40 = vrot.slane %v3003_v52, 4  ;;  %v2891_v37 = vperm.slane %v2885_v32, %v3926_v12  ;;  %vm5320_vm10 = vcmp.eq.f32.partialorder %v2820_v43, 8.507059e+37  ;;  %v3645_v0 = vpop.eup %3644 }
 0x369   :  { %v2823_v31 = vor.u32 1.1754944e-38, %v2822_v25  ;;  %v2932_v42 = vrot.slane %v2895_v41, 4  ;;  %vm2817_vm11 = vweird.f32 %v5288_v26  ;;  %vm2696_vm12 = vweird.f32 %v5244_v56 }
 0x36a   :  { %vm5326_vm13 = vcmp.eq.f32.partialorder %v2700_v59, 8.507059e+37  ;;  %v5331_v10 = vperm.slane %v2935_v13, %v3944_v36  ;;  %v3033_v5 = vsel %vm254_vm0, %v3032_v40, %v5228_v54  ;;  %v5336_v35 = vperm.slane %v3047_v11, %v3944_v36  ;;  %vm2818_vm14 = vmor %vm2816_vm9, %vm2817_vm11 }
 0x36b   :  { %v2703_v44 = vor.u32 1.1754944e-38, %v2702_v48  ;;  %v3035_v18 = vsel %vm254_vm0, %v3003_v52, %v3034_v60  ;;  %v3045_v27 = vsel %vm254_vm0, %v3044_v38, %v5241_v2  ;;  %v2815_v57 = vadd.f32 %v5288_v26, %v2814_v22  ;;  %v2567_v52 = vpop.f32.mrf.mxu3 }
 0x36c   :  { %v2694_v29 = vmul.f32 %v3643_v16, %v2693_v34  ;;  %v2920_v23 = vrot.slane %v2891_v37, 4  ;;  %v2923_v47 = vsel %vm254_vm0, %v2891_v37, %v2922_v4  ;;  %vm2697_vm15 = vweird.f32 %v3643_v16 }
 0x36d   :  { %v2827_v54 = vmul.f32 %v3645_v0, %v5292_v28  ;;  %v2933_v60 = vsel %vm254_vm0, %v2932_v42, %v5263_v53  ;;  %v5351_v6 = vperm.slane %v3033_v5, %v3944_v36  ;;  %v2819_v2 = vsel %vm2818_vm14, %v5288_v26, %v2815_v57  ;;  %vm2698_vm2 = vmor %vm2696_vm12, %vm2697_vm15 }
 0x36e   :  { %v2695_v19 = vadd.f32 %v3643_v16, %v2694_v29  ;;  %v5355_v43 = vperm.slane %v3035_v18, %v3944_v36  ;;  %v5358_v15 = vperm.slane %v3045_v27, %v3944_v36  ;;  %v2824_v3 = vsel %vm5320_vm10, %v2823_v31, %v2819_v2 }
 0x36f   :  { %v2828_v9 = vsub.f32 1.0, %v2827_v54  ;;  %vm2832_vm3 = vweird.f32 %v3645_v0  ;;  %v2837_v63 = vand.u32 2147483648, %v5292_v28  ;;  %3646 = vrcp.f32 %v5346_v58 }
 0x370   :  { %v2699_v53 = vsel %vm2698_vm2, %v3643_v16, %v2695_v19  ;;  %v2825_v26 = vmul.f32 0.25, %v2824_v3  ;;  %v2835_v30 = vand.u32 2147483647, %v5292_v28  ;;  %v5370_v25 = vperm.slane %v2923_v47, %v3944_v36 }
 0x371   :  { %v2704_v50 = vsel %vm5326_vm13, %v2703_v44, %v2699_v53  ;;  %v2829_v14 = vmul.f32 %v3645_v0, %v2828_v9  ;;  %v3094_v56 = vrot.slane %v5336_v35, 4  ;;  %vm2831_vm4 = vweird.f32 %v5292_v28 }
 0x372   :  { %v2705_v62 = vmul.f32 0.25, %v2704_v50  ;;  %v5375_v16 = vperm.slane %v2933_v60, %v3944_v36  ;;  %v2982_v24 = vrot.slane %v5331_v10, 4  ;;  %v3082_v46 = vrot.slane %v5351_v6, 4  ;;  %vm2833_vm5 = vmor %vm2831_vm4, %vm2832_vm3 }
 0x373   :  { %v2830_v39 = vadd.f32 %v3645_v0, %v2829_v14  ;;  %v3086_v4 = vrot.slane %v5355_v43, 4  ;;  %v3090_v41 = vrot.slane %v5358_v15, 4  ;;  %v2838_v32 = vor.u32 1.1754944e-38, %v2837_v63 }
 0x374   :  { %v2861_v59 = vmul.f32 %v2705_v62, %v5213_v7  ;;  %v5383_v38 = vmul.f32 %v2825_v26, %v2567_v52  ;;  %vm2836_vm6 = vcmp.eq.f32.partialorder %v2835_v30, 8.507059e+37  ;;  %v2921_v11 = vsel %vm254_vm0, %v2920_v23, %v5295_v8 }
 0x375   :  { %v2834_v28 = vsel %vm2833_vm5, %v3645_v0, %v2830_v39  ;;  %v3647_v48 = vpop.eup %3646  ;;  %vm2846_vm7 = vweird.f32 %v5346_v58  ;;  %v2850_v7 = vand.u32 2147483647, %v5346_v58  ;;  %v2852_v31 = vand.u32 2147483648, %v5346_v58  ;;  %v2590_v0 = vpop.f32.mrf.mxu0 }
 0x376   :  { %v2909_v13 = vsel %vm254_vm0, %v2908_v51, %v2861_v59  ;;  %v2910_v40 = vrot.slane %v2861_v59, 4  ;;  %v2839_v22 = vsel %vm2836_vm6, %v2838_v32, %v2834_v28  ;;  %v2842_v45 = vmul.f32 %v3647_v48, %v5346_v58 }
 0x377   :  { %v2915_v34 = vperm.slane %v2909_v13, %v3926_v12  ;;  %v2840_v37 = vmul.f32 0.25, %v2839_v22  ;;  %v2927_v42 = vperm.slane %v2921_v11, %v3944_v36  ;;  %v2974_v51 = vrot.slane %v5370_v25, 4 }
 0x378   :  { %v2911_v8 = vsel %vm254_vm0, %v5135_v20, %v2910_v40  ;;  %v2978_v33 = vrot.slane %v5375_v16, 4  ;;  %v3022_v57 = vrot.slane %v5383_v38, 4  ;;  %v2843_v23 = vsub.f32 1.0, %v2842_v45  ;;  %v2613_v40 = vpop.f32.mrf.mxu1 }
 0x379   :  { %v2919_v5 = vperm.slane %v2911_v8, %v3926_v12  ;;  %v2944_v44 = vrot.slane %v2915_v34, 4  ;;  %v2947_v18 = vsel %vm254_vm0, %v2915_v34, %v2946_v55  ;;  %v2870_v27 = vmul.f32 %v2840_v37, %v2590_v0 }
 0x37a   :  { %v2955_v29 = vperm.slane %v2947_v18, %v3944_v36  ;;  %vm5406_vm8 = vcmp.eq.f32.partialorder %v2850_v7, 8.507059e+37  ;;  %v2844_v3 = vmul.f32 %v3647_v48, %v2843_v23  ;;  %vm2847_vm9 = vweird.f32 %v3647_v48 }
 0x37b   :  { %v2956_v47 = vrot.slane %v2919_v5, 4  ;;  %v2959_v54 = vsel %vm254_vm0, %v2919_v5, %v2958_v1  ;;  %v3008_v60 = vrot.slane %v2870_v27, 4  ;;  %v3011_v55 = vsel %vm254_vm0, %v2870_v27, %v3010_v21  ;;  %vm2848_vm10 = vmor %vm2846_vm7, %vm2847_vm9 }
 0x37c   :  { %v2967_v2 = vperm.slane %v2959_v54, %v3944_v36  ;;  %v2972_v19 = vrot.slane %v2955_v29, 4  ;;  %v2853_v9 = vor.u32 1.1754944e-38, %v2852_v31  ;;  %v2945_v53 = vsel %vm254_vm0, %v2944_v44, %v5203_v49 }
 0x37d   :  { %v2957_v63 = vsel %vm254_vm0, %v2956_v47, %v5221_v17  ;;  %v2970_v26 = vrot.slane %v2927_v42, 4  ;;  %v3009_v1 = vsel %vm254_vm0, %v3008_v60, %v5230_v61  ;;  %v3019_v14 = vperm.slane %v3011_v55, %v3926_v12 }
 0x37e   :  { %v2980_v50 = vrot.slane %v2967_v2, 4  ;;  %v2845_v21 = vadd.f32 %v3647_v48, %v2844_v3  ;;  %v2951_v30 = vperm.slane %v2945_v53, %v3944_v36  ;;  %v2963_v62 = vperm.slane %v2957_v63, %v3944_v36 }
 0x37f   :  { %v2973_v49 = vsel %vm254_vm0, %v2972_v19, %v5370_v25  ;;  %v5431_v17 = vsel %vm254_vm0, %v2955_v29, %v2974_v51  ;;  %v5438_v52 = vsel %vm254_vm0, %v2967_v2, %v2982_v24  ;;  %v3015_v11 = vperm.slane %v3009_v1, %v3926_v12 }
 0x380   :  { %v2849_v39 = vsel %vm2848_vm10, %v3647_v48, %v2845_v21  ;;  %v5435_v61 = vsel %vm254_vm0, %v2980_v50, %v5331_v10  ;;  %v3096_v58 = vrot.slane %v2973_v49, 4  ;;  %v2968_v32 = vrot.slane %v2951_v30, 4 }
 0x381   :  { %v2854_v59 = vsel %vm5406_vm8, %v2853_v9, %v2849_v39  ;;  %v5443_v28 = vsel %vm254_vm0, %v2951_v30, %v2970_v26  ;;  %v2976_v25 = vrot.slane %v2963_v62, 4  ;;  %v5447_v48 = vsel %vm254_vm0, %v2963_v62, %v2978_v33 }
 0x382   :  { %v2855_v13 = vmul.f32 0.25, %v2854_v59  ;;  %v3108_v10 = vrot.slane %v5431_v17, 4  ;;  %v2969_v24 = vsel %vm254_vm0, %v2968_v32, %v2927_v42  ;;  %v3120_v7 = vrot.slane %v5435_v61, 4 }
 0x383   :  { %v5453_v22 = vsel %vm254_vm0, %v2976_v25, %v5375_v16  ;;  %v3132_v34 = vrot.slane %v5438_v52, 4  ;;  %v3097_v45 = vsel %vm254_vm0, %v3096_v58, %v2969_v24  ;;  %v3098_v0 = vrot.slane %v2969_v24, 4 }
 0x384   :  { %v2871_v37 = vmul.f32 %v2855_v13, %v2613_v40  ;;  %v3109_v31 = vsel %vm254_vm0, %v3108_v10, %v5443_v28  ;;  %v3103_v8 = vperm.slane %v3097_v45, %v3926_v12  ;;  %v3121_v42 = vsel %vm254_vm0, %v3120_v7, %v5453_v22 }
 0x385   :  { %v3115_v51 = vperm.slane %v3109_v31, %v3926_v12  ;;  %v3133_v16 = vsel %vm254_vm0, %v3132_v34, %v5447_v48  ;;  %v3127_v44 = vperm.slane %v3121_v42, %v3926_v12  ;;  %v3070_v27 = vrot.slane %v3019_v14, 4 }
 0x386   :  { %v3020_v33 = vrot.slane %v2871_v37, 4  ;;  %v3023_v5 = vsel %vm254_vm0, %v2871_v37, %v3022_v57  ;;  %v3139_v18 = vperm.slane %v3133_v16, %v3926_v12  ;;  %v3099_v20 = vsel %vm254_vm0, %v2973_v49, %v3098_v0 }
 0x387   :  { %v3031_v29 = vperm.slane %v3023_v5, %v3926_v12  ;;  %v3144_v23 = vrot.slane %v3115_v51, 4  ;;  %v3058_v47 = vrot.slane %v3015_v11, 4  ;;  %v3110_v60 = vrot.slane %v5443_v28, 4 }
 0x388   :  { %v3021_v54 = vsel %vm254_vm0, %v3020_v33, %v5383_v38  ;;  %v3170_v55 = vrot.slane %v3127_v44, 4  ;;  %v3146_v3 = vrot.slane %v3103_v8, 4  ;;  %v3168_v63 = vrot.slane %v3139_v18, 4 }
 0x389   :  { %v3027_v2 = vperm.slane %v3021_v54, %v3926_v12  ;;  %v3068_v57 = vrot.slane %v3031_v29, 4  ;;  %v3071_v19 = vsel %vm254_vm0, %v3031_v29, %v3070_v27  ;;  %v5479_v26 = vperm.slane %v3099_v20, %v3926_v12 }
 0x38a   :  { %v3079_v9 = vperm.slane %v3071_v19, %v3944_v36  ;;  %v3171_v53 = vsel %vm254_vm0, %v3139_v18, %v3170_v55  ;;  %v3145_v21 = vsel %vm254_vm0, %v3144_v23, %v3103_v8  ;;  %v3147_v59 = vsel %vm254_vm0, %v3115_v51, %v3146_v3 }
 0x38b   :  { %v3056_v50 = vrot.slane %v3027_v2, 4  ;;  %v3059_v38 = vsel %vm254_vm0, %v3027_v2, %v3058_v47  ;;  %v3069_v1 = vsel %vm254_vm0, %v3068_v57, %v3019_v14  ;;  %v5494_v32 = vperm.slane %v3171_v53, %v3944_v36 }
 0x38c   :  { %v3092_v30 = vrot.slane %v3079_v9, 4  ;;  %v3067_v62 = vperm.slane %v3059_v38, %v3944_v36  ;;  %v3075_v49 = vperm.slane %v3069_v1, %v3944_v36  ;;  %v5489_v39 = vsel %vm254_vm0, %v3079_v9, %v3094_v56 }
 0x38d   :  { %v3057_v58 = vsel %vm254_vm0, %v3056_v50, %v3015_v11  ;;  %v3244_v14 = vrot.slane %v5489_v39, 4  ;;  %v5514_v24 = vperm.slane %v3145_v21, %v3944_v36  ;;  %v3169_v16 = vsel %vm254_vm0, %v3168_v63, %v3127_v44 }
 0x38e   :  { %v3063_v28 = vperm.slane %v3057_v58, %v3944_v36  ;;  %v3084_v25 = vrot.slane %v3067_v62, 4  ;;  %v5501_v13 = vsel %vm254_vm0, %v3067_v62, %v3086_v4  ;;  %v3088_v10 = vrot.slane %v3075_v49, 4 }
 0x38f   :  { %v5506_v56 = vsel %vm254_vm0, %v3075_v49, %v3090_v41  ;;  %v5510_v11 = vsel %vm254_vm0, %v3092_v30, %v5336_v35  ;;  %v3220_v40 = vrot.slane %v5501_v13, 4  ;;  %v3196_v35 = vrot.slane %v5494_v32, 4 }
 0x390   :  { %v3080_v7 = vrot.slane %v3063_v28, 4  ;;  %v5519_v4 = vsel %vm254_vm0, %v3063_v28, %v3082_v46  ;;  %v3085_v34 = vsel %vm254_vm0, %v3084_v25, %v5355_v43  ;;  %v5525_v41 = vsel %vm254_vm0, %v3088_v10, %v5358_v15 }
 0x391   :  { %v3208_v37 = vrot.slane %v3085_v34, 4  ;;  %v3221_v45 = vsel %vm254_vm0, %v3220_v40, %v5519_v4  ;;  %v3232_v31 = vrot.slane %v5510_v11, 4  ;;  %v3155_v46 = vperm.slane %v3147_v59, %v3944_v36 }
 0x392   :  { %v3081_v0 = vsel %vm254_vm0, %v3080_v7, %v5351_v6  ;;  %v3227_v8 = vperm.slane %v3221_v45, %v3926_v12  ;;  %v3245_v43 = vsel %vm254_vm0, %v3244_v14, %v5506_v56  ;;  %v5545_v5 = vperm.slane %v3169_v16, %v3944_v36 }
 0x393   :  { %v3209_v15 = vsel %vm254_vm0, %v3208_v37, %v3081_v0  ;;  %v3233_v51 = vsel %vm254_vm0, %v3232_v31, %v5525_v41  ;;  %v3251_v42 = vperm.slane %v3245_v43, %v3926_v12  ;;  %v3194_v18 = vrot.slane %v5514_v24, 4 }
 0x394   :  { %v3215_v33 = vperm.slane %v3209_v15, %v3926_v12  ;;  %v3239_v6 = vperm.slane %v3233_v51, %v3926_v12  ;;  %v3197_v27 = vsel %vm254_vm0, %v3196_v35, %v3155_v46  ;;  %v3256_v29 = vrot.slane %v3227_v8, 4 }
 0x395   :  { %v3280_v23 = vrot.slane %v3251_v42, 4  ;;  %v3111_v20 = vsel %vm254_vm0, %v5431_v17, %v3110_v60  ;;  %v3222_v47 = vrot.slane %v5519_v4, 4  ;;  %v3246_v44 = vrot.slane %v5506_v56, 4 }
 0x396   :  { %v3258_v54 = vrot.slane %v3215_v33, 4  ;;  %v3282_v55 = vrot.slane %v3239_v6, 4  ;;  %v3257_v2 = vsel %vm254_vm0, %v3256_v29, %v3215_v33  ;;  %v3198_v19 = vrot.slane %v3155_v46, 4 }
 0x397   :  { %v3281_v57 = vsel %vm254_vm0, %v3280_v23, %v3239_v6  ;;  %v3119_v3 = vperm.slane %v3111_v20, %v3926_v12  ;;  %v3195_v17 = vsel %vm254_vm0, %v5545_v5, %v3194_v18  ;;  %v5561_v60 = vperm.slane %v3257_v2, %v3944_v36 }
 0x398   :  { %v3259_v9 = vsel %vm254_vm0, %v3227_v8, %v3258_v54  ;;  %v3283_v53 = vsel %vm254_vm0, %v3251_v42, %v3282_v55  ;;  %v3122_v38 = vrot.slane %v5453_v22, 4  ;;  %v3134_v1 = vrot.slane %v5447_v48, 4 }
 0x399   :  { %v3267_v63 = vperm.slane %v3259_v9, %v3944_v36  ;;  %v3291_v50 = vperm.slane %v3283_v53, %v3944_v36  ;;  %v3287_v21 = vperm.slane %v3281_v57, %v3944_v36  ;;  %v3306_v30 = vrot.slane %v5561_v60, 4 }
 0x39a   :  { %v3156_v62 = vrot.slane %v3119_v3, 4  ;;  %v3210_v49 = vrot.slane %v3081_v0, 4  ;;  %v3123_v14 = vsel %vm254_vm0, %v5435_v61, %v3122_v38  ;;  %v3135_v28 = vsel %vm254_vm0, %v5438_v52, %v3134_v1 }
 0x39b   :  { %v3308_v58 = vrot.slane %v3291_v50, 4  ;;  %v3310_v59 = vrot.slane %v3267_v63, 4  ;;  %v3307_v25 = vsel %vm254_vm0, %v3287_v21, %v3306_v30  ;;  %v3131_v22 = vperm.slane %v3123_v14, %v3926_v12 }
 0x39c   :  { %v3143_v48 = vperm.slane %v3135_v28, %v3926_v12  ;;  %v3157_v10 = vsel %vm254_vm0, %v3156_v62, %v5479_v26  ;;  %v3563_v40 = vpack.i.bf16 %v3307_v25, %v3195_v17  ;;  %v3199_v7 = vsel %vm254_vm0, %v5494_v32, %v3198_v19  ;;  %v3411_v28 = vld [vmem:[#allocation7 + $0x78] sm:$0xff]  ;;  %v3409_v25 = vld [vmem:[#allocation7 + $0x68] sm:$0xff] }
 0x39d   :  { %v3309_v56 = vsel %vm254_vm0, %v3308_v58, %v3267_v63  ;;  %v3311_v61 = vsel %vm254_vm0, %v3291_v50, %v3310_v59  ;;  %v3211_v37 = vsel %vm254_vm0, %v3085_v34, %v3210_v49  ;;  %v3163_v45 = vperm.slane %v3157_v10, %v3944_v36  ;;  %3416 = vmatpush.msra.mxu2 %v3411_v28  ;;  %v3406_v10 = vld [vmem:[#allocation7 + $0x50] sm:$0xff] }
 0x39e   :  { %v3573_v4 = vpack.i.bf16 %v3309_v56, %v3197_v27  ;;  %v3568_v35 = vpack.i.bf16 %v3311_v61, %v3199_v7  ;;  %v3180_v52 = vrot.slane %v3143_v48, 4  ;;  %3564 = vrot.lane.b32.xlu0 %v3563_v40, %s3790_s19  ;;  %v3219_v31 = vperm.slane %v3211_v37, %v3926_v12  ;;  %v3405_v56 = vld [vmem:[#allocation7 + $0x48] sm:$0xff]  ;;  %v3404_v40 = vld [vmem:[#allocation7 + $0x40] sm:$0xff]  ;;  %v3403_v7 = vld [vmem:[#allocation7 + $0x38] sm:$0xff] }
 0x39f   :  { %v3223_v0 = vsel %vm254_vm0, %v5501_v13, %v3222_v47  ;;  %v3234_v46 = vrot.slane %v5525_v41, 4  ;;  %v3247_v34 = vsel %vm254_vm0, %v5489_v39, %v3246_v44  ;;  %v3158_v43 = vrot.slane %v5479_v26, 4  ;;  %v3402_v61 = vld [vmem:[#allocation7 + $0x30] sm:$0xff] }
 0x3a0   :  { %3574 = vrot.lane.b32.xlu1 %v3573_v4, %s3787_s16  ;;  %3569 = vrot.lane.b32.xlu2 %v3568_v35, %s3784_s2  ;;  %v3181_v32 = vsel %vm254_vm0, %v3180_v52, %v3131_v22  ;;  %v3231_v8 = vperm.slane %v3223_v0, %v3926_v12  ;;  %v3255_v41 = vperm.slane %v3247_v34, %v3926_v12  ;;  %v3182_v51 = vrot.slane %v3131_v22, 4  ;;  %v3408_v22 = vld [vmem:[#allocation7 + $0x60] sm:$0xff]  ;;  %v3401_v4 = vld [vmem:[#allocation7 + $0x28] sm:$0xff]  ;;  %v3399_v52 = vld [vmem:[#allocation7 + $0x18] sm:$0xff] }
 0x3a1   :  { %v3187_v15 = vperm.slane %v3181_v32, %v3944_v36  ;;  %v3235_v13 = vsel %vm254_vm0, %v5510_v11, %v3234_v46  ;;  %v3159_v33 = vsel %vm254_vm0, %v3119_v3, %v3158_v43  ;;  %v3270_v6 = vrot.slane %v3219_v31, 4  ;;  %v3400_v35 = vld [vmem:[#allocation7 + $0x20] sm:$0xff]  ;;  %v3398_v37 = vld [vmem:[#allocation7 + $0x10] sm:$0xff] }
 0x3a2   :  { %v3243_v42 = vperm.slane %v3235_v13, %v3926_v12  ;;  %v3268_v16 = vrot.slane %v3231_v8, 4  ;;  %v3192_v18 = vrot.slane %v5545_v5, 4  ;;  %v3202_v27 = vrot.slane %v3163_v45, 4 }
 0x3a3   :  { %v3292_v39 = vrot.slane %v3255_v41, 4  ;;  %v3167_v26 = vperm.slane %v3159_v33, %v3944_v36  ;;  %v3304_v29 = vrot.slane %v3287_v21, 4  ;;  %v3183_v11 = vsel %vm254_vm0, %v3143_v48, %v3182_v51  ;;  %v3407_v48 = vld [vmem:[#allocation7 + $0x58] sm:$0xff] }
 0x3a4   :  { %v3269_v23 = vsel %vm254_vm0, %v3268_v16, %v3219_v31  ;;  %v3191_v47 = vperm.slane %v3183_v11, %v3944_v36  ;;  %v3271_v12 = vsel %vm254_vm0, %v3231_v8, %v3270_v6  ;;  %v3200_v44 = vrot.slane %v3187_v15, 4  ;;  %v3396_v31 = vld [vmem:[#allocation7] sm:$0xff] }
 0x3a5   :  { %v3293_v20 = vsel %vm254_vm0, %v3292_v39, %v3243_v42  ;;  %v3275_v54 = vperm.slane %v3269_v23, %v3944_v36  ;;  %v3206_v55 = vrot.slane %v3167_v26, 4  ;;  %v3203_v2 = vsel %vm254_vm0, %v3187_v15, %v3202_v27 }
 0x3a6   :  { %v3299_v5 = vperm.slane %v3293_v20, %v3944_v36  ;;  %v3294_v57 = vrot.slane %v3243_v42, 4  ;;  %v5614_v19 = vsel %vm254_vm0, %v3192_v18, %v5514_v24  ;;  %v3279_v53 = vperm.slane %v3271_v12, %v3944_v36 }
 0x3a7   :  { %v3207_v9 = vsel %vm254_vm0, %v3191_v47, %v3206_v55  ;;  %v5621_v17 = vsel %vm254_vm0, %v3304_v29, %v5561_v60  ;;  %v3201_v63 = vsel %vm254_vm0, %v3200_v44, %v3163_v45  ;;  %v3314_v24 = vrot.slane %v3275_v54, 4  ;;  %v3397_v45 = vld [vmem:[#allocation7 + $0x8] sm:$0xff] }
 0x3a8   :  { %3354 = vrot.lane.b32.xlu1 %v3203_v2, %s3788_s17  ;;  %v3312_v3 = vrot.slane %v3299_v5, 4  ;;  %3370 = vrot.lane.b32.xlu2 %v3207_v9, %s3786_s15  ;;  %v3295_v1 = vsel %vm254_vm0, %v3255_v41, %v3294_v57  ;;  %v3318_v21 = vrot.slane %v3279_v53, 4  ;;  %v3204_v60 = vrot.slane %v3191_v47, 4  ;;  %v3583_v9 = vld [vmem:[%s5666_s4] ss:$0 sm:$0xff] }
 0x3a9   :  { %v3303_v30 = vperm.slane %v3295_v1, %v3944_v36  ;;  %v3315_v62 = vsel %vm254_vm0, %v3299_v5, %v3314_v24  ;;  %v3410_v36 = vld [vmem:[#allocation7 + $0x70] sm:$0xff]  ;;  %vm3381_vm11 = vcmask 392192   ;;  %vm3384_vm12 = vcmask 523264  }
 0x3aa   :  { %v3313_v50 = vsel %vm254_vm0, %v3312_v3, %v3275_v54  ;;  %v3205_v58 = vsel %vm254_vm0, %v3204_v60, %v3167_v26  ;;  %3417 = vmatpush.msra.mxu2 %v3410_v36  ;;  %vm3387_vm13 = vcmask 654336   ;;  %vm3390_vm14 = vcmask 785408  }
 0x3ab   :  { %v3578_v38 = vpack.i.bf16 %v3313_v50, %v3201_v63  ;;  %v3319_v49 = vsel %vm254_vm0, %v3303_v30, %v3318_v21  ;;  %v3316_v59 = vrot.slane %v3303_v30, 4  ;;  %vm3393_vm15 = vcmask 916480  }
 0x3ac   :  { %3418 = vmatpush.msra.mxu2 %v3409_v25 }
 0x3ad   :  { %3579 = vrot.lane.b32.xlu0 %v3578_v38, %s3785_s3  ;;  %v3317_v14 = vsel %vm254_vm0, %v3316_v59, %v3279_v53  ;;  %vm3378_vm0 = vcmask 261120  }
 0x3ae   :  { %3419 = vmatpush.msra.mxu2 %v3408_v22 }
 0x3b0   :  { %3356 = vrot.lane.b32.xlu1 %v3315_v62, %s3788_s17  ;;  %3372 = vrot.lane.b32.xlu2 %v3319_v49, %s3786_s15 }
 0x3b1   :  { %3420 = vmatpush.msra.mxu2 %v3407_v48 }
 0x3b3   :  { %3421 = vmatpush.msra.mxu2 %v3406_v10 }
 0x3b5   :  { %3362 = vrot.lane.b32.xlu0 %v3205_v58, %s3789_s18  ;;  %3422 = vmatpush.msra.mxu2 %v3405_v56 }
 0x3b7   :  { %3423 = vmatpush.msra.mxu2 %v3404_v40 }
 0x3b9   :  { %3424 = vmatpush.msra.mxu2 %v3403_v7 }
 0x3bb   :  { %3425 = vmatpush.msra.mxu2 %v3402_v61 }
 0x3bd   :  { %3364 = vrot.lane.b32.xlu0 %v3317_v14, %s3789_s18  ;;  %3426 = vmatpush.msra.mxu2 %v3401_v4 }
 0x3bf   :  { %3427 = vmatpush.msra.mxu2 %v3400_v35 }
 0x3c1   :  { %3428 = vmatpush.msra.mxu2 %v3399_v52 }
 0x3c3   :  { %3429 = vmatpush.msra.mxu2 %v3398_v37 }
 0x3c5   :  { %3430 = vmatpush.msra.mxu2 %v3397_v45 }
 0x3c7   :  { %3431 = vmatpush.msra.mxu2 %v3396_v31 }
 0x3fa   :  { %v3570_v8 = vpop.permute.xlu2 %3569 }
 0x3fb   :  { %v3571_v51 = vunpack.i.l.bf16 %v3570_v8  ;;  %v3572_v12 = vunpack.i.h.bf16 %v3570_v8 }
 0x402   :  { %v3371_v18 = vpop.permute.xlu2 %3370 }
 0x40a   :  { %v3373_v57 = vpop.permute.xlu2 %3372 }
 0x410   :  { %v3565_v0 = vpop.permute.xlu0 %3564 }
 0x411   :  { %v3566_v32 = vunpack.i.l.bf16 %v3565_v0  ;;  %v3567_v16 = vunpack.i.h.bf16 %v3565_v0 }
 0x412   :  { %v3575_v46 = vpop.permute.xlu1 %3574 }
 0x413   :  { %v3576_v34 = vunpack.i.l.bf16 %v3575_v46  ;;  %v3376_v43 = vsel %vm1686_vm1, %v5614_v19, %v3566_v32  ;;  %v3577_v27 = vunpack.i.h.bf16 %v3575_v46  ;;  %v3377_v39 = vsel %vm1686_vm1, %v5621_v17, %v3567_v16 }
 0x415   :  { %v3379_v13 = vsel %vm3378_vm0, %v3376_v43, %v3576_v34  ;;  %v3380_v47 = vsel %vm3378_vm0, %v3377_v39, %v3577_v27 }
 0x416   :  { %v3382_v33 = vsel %vm3381_vm11, %v3379_v13, %v3571_v51  ;;  %v3383_v54 = vsel %vm3381_vm11, %v3380_v47, %v3572_v12 }
 0x41a   :  { %v3355_v42 = vpop.permute.xlu1 %3354 }
 0x41f   :  { %v3580_v15 = vpop.permute.xlu0 %3579 }
 0x420   :  { %v3581_v41 = vunpack.i.l.bf16 %v3580_v15  ;;  %v3582_v20 = vunpack.i.h.bf16 %v3580_v15 }
 0x422   :  { %v3385_v6 = vsel %vm3384_vm12, %v3382_v33, %v3581_v41  ;;  %v3357_v44 = vpop.permute.xlu1 %3356  ;;  %v3386_v5 = vsel %vm3384_vm12, %v3383_v54, %v3582_v20 }
 0x423   :  { %v3388_v29 = vsel %vm3387_vm13, %v3385_v6, %v3355_v42  ;;  %v3389_v55 = vsel %vm3387_vm13, %v3386_v5, %v3357_v44 }
 0x427   :  { %v3363_v26 = vpop.permute.xlu0 %3362 }
 0x428   :  { %v3391_v23 = vsel %vm3390_vm14, %v3388_v29, %v3363_v26 }
 0x429   :  { %v3394_v11 = vsel %vm3393_vm15, %v3391_v23, %v3371_v18 }
 0x42a   :  { %3432 = vmatmul.f32.vlgmr.msra.gmra.mxu2 %v3394_v11 }
 0x42f   :  { %v3365_v2 = vpop.permute.xlu0 %3364 }
 0x430   :  { %v3392_v19 = vsel %vm3390_vm14, %v3389_v55, %v3365_v2 }
 0x431   :  { %v3395_v3 = vsel %vm3393_vm15, %v3392_v19, %v3373_v57 }
 0x432   :  { %3435 = vmatmul.f32.gmra.mxu2 %v3395_v3 }
 0x4ad   :  { %v3433_v53 = vpop.f32.mrf.mxu2 }
 0x4ae   :  { %v3434_v17 = vadd.f32 %v3583_v9, %v3433_v53 }
 0x4b0   :  { %3439 = vst [vmem:[#allocation10] sm:$0xff] %v3434_v17 }
 0x4b5   :  { %v3436_v63 = vpop.f32.mrf.mxu2 }
 0x4b6   :  { %v3437_v50 = vadd.f32 %v3583_v9, %v3436_v63 }
 0x4b8   :  { %3440 = vst [vmem:[#allocation10 + $0x8] sm:$0xff] %v3437_v50 }
 0x4b9   :  { %3453 = dma.vmem_to_hbm [thread:$0]  %s3446_s23, 256, %s3448_s26, [#allocation4], %s3780_s30, %s3780_s30, %s3781_s6  }
 0x4ba   :  { %3774 = dma.done.wait [#allocation4], 256  }
 0x4bb   :  { %3775 = vsyncadd [#allocation4], 4294967040 }
 0x4bc   :  { %3458 = vsyncpa [#allocation3], 1 }
 0x4bd   :  { %3459 = vsyncpa [#allocation6], 1 }
 0x4be   :  { %3460 = vsyncpa [#allocation9], 1 }
 0x4bf   :  { %3461 = vsyncpa [#allocation4], 1 }

</bundles_post_ra>
